<compile_context>
chip_gen: v7x
topology: tpu7x:2x2x1
jax: 0.10.0
libtpu: 0.0.40
codegen_flags: <defaults>
</compile_context>

<pallas_src>
import math

import jax
import jax.numpy as jnp
import numpy as np
from jax.experimental import pallas as pl
from jax.experimental.pallas import tpu as pltpu

NEG_INF = -1e20          # neginf(torch.float32) from the reference code
LN_EPS = 1e-5            # PyTorch LayerNorm default eps
VMEM_LIMIT = 32 * 1024 * 1024


def _layer_norm(v, g, b):
    mu = jnp.mean(v, axis=-1, keepdims=True)
    var = jnp.mean((v - mu) ** 2, axis=-1, keepdims=True)
    return (v - mu) * jax.lax.rsqrt(var + LN_EPS) * g + b


def _mm(a, b):
    """2-D matmul on the MXU: bf16 inputs, f32 accumulation."""
    return jnp.dot(a.astype(jnp.bfloat16), b.astype(jnp.bfloat16),
                   preferred_element_type=jnp.float32)


def _bmm(eq, a, b):
    """Batched matmul (einsum) on the MXU: bf16 inputs, f32 accumulation."""
    return jnp.einsum(eq, a.astype(jnp.bfloat16), b.astype(jnp.bfloat16),
                      preferred_element_type=jnp.float32)


def _softmax(s):
    m = jnp.max(s, axis=-1, keepdims=True)
    p = jnp.exp(s - m)
    return p * pl.reciprocal(jnp.sum(p, axis=-1, keepdims=True), approx=True)


def decoder_body_kernel(
    x_ref, mem_ref, causal_ref, kpad_ref,
    sa_wqkv, sa_bqkv, sa_wo, sa_bo,
    ca_wq, ca_bq, ca_wkv, ca_bkv, ca_wo, ca_bo,
    ln_g, ln_b,
    ff_w1, ff_b1, ff_w2, ff_b2,
    h_ref,
):
    BB, T, D = x_ref.shape
    S = mem_ref.shape[1]
    M = BB * T

    x = x_ref[...].reshape(M, D)                 # fold batch rows into the matmul M dim
    bias = causal_ref[...] + kpad_ref[...]       # (BB, T, T): causal + key-padding bias

    # ---- masked self-attention (QKV fused; 1/sqrt(D) folded into the Q weights) ----
    qkv = _mm(x, sa_wqkv[...]) + sa_bqkv[...]    # (M, 3D)
    q = qkv[:, :D].reshape(BB, T, D)
    k = qkv[:, D:2 * D].reshape(BB, T, D)
    v = qkv[:, 2 * D:].reshape(BB, T, D)
    p = _softmax(_bmm("btd,bsd->bts", q, k) + bias)
    ctx = _bmm("bts,bsd->btd", p, v).reshape(M, D)
    sa = _mm(ctx, sa_wo[...]) + sa_bo[...]
    x = _layer_norm(x + sa, ln_g[0:1, :], ln_b[0:1, :])

    # ---- cross-attention over encoder memory (KV fused, no mask) ----
    q = (_mm(x, ca_wq[...]) + ca_bq[...]).reshape(BB, T, D)
    kv = _mm(mem_ref[...].reshape(BB * S, D), ca_wkv[...]) + ca_bkv[...]
    k = kv[:, :D].reshape(BB, S, D)
    v = kv[:, D:].reshape(BB, S, D)
    p = _softmax(_bmm("btd,bsd->bts", q, k))
    ctx = _bmm("bts,bsd->btd", p, v).reshape(M, D)
    ca = _mm(ctx, ca_wo[...]) + ca_bo[...]
    x = _layer_norm(x + ca, ln_g[1:2, :], ln_b[1:2, :])

    # ---- feed-forward (ReLU) ----
    h = jnp.maximum(_mm(x, ff_w1[...]) + ff_b1[...], 0.0)
    ff = _mm(h, ff_w2[...]) + ff_b2[...]
    x = _layer_norm(x + ff, ln_g[2:3, :], ln_b[2:3, :])

    # ---- final TransformerDecoder norm ----
    x = _layer_norm(x, ln_g[3:4, :], ln_b[3:4, :])

    h_ref[...] = x.reshape(BB, T, D).astype(h_ref.dtype)


def fc_kernel(h_ref, w_ref, b_ref, out_ref):
    BB, T, D = h_ref.shape
    tv = out_ref.shape[-1]
    logits = _mm(h_ref[...].reshape(BB * T, D), w_ref[...]) + b_ref[...]
    out_ref[...] = logits.reshape(BB, T, tv).astype(out_ref.dtype)


BODY_WEIGHT_NAMES = [
    "sa_wqkv", "sa_bqkv", "sa_wo", "sa_bo",
    "ca_wq", "ca_bq", "ca_wkv", "ca_bkv", "ca_wo", "ca_bo",
    "ln_g", "ln_b",
    "ff_w1", "ff_b1", "ff_w2", "ff_b2",
]


def _round_up(n, m):
    return ((n + m - 1) // m) * m


def _batch_block(B, max_bb=8):
    bb = min(B, max_bb)
    while B % bb:
        bb -= 1
    return bb


def decoder_forward(tgt_ids, memory, mask, params, *, tile_v=512, out_dtype=jnp.float32):
    """tgt_ids: (B,T) int32 token ids; memory: (B,S,D); mask: (B,T) bool, True = valid."""
    B, T = tgt_ids.shape
    S = memory.shape[1]
    D = params["emb"].shape[1]
    V = params["fc_w"].shape[1]
    scale = 1.0 / math.sqrt(D)           # nhead == 1 -> head_dim == d_model
    f32, bf16 = jnp.float32, jnp.bfloat16

    # --- glue (cheap XLA ops outside the kernels): embedding gather + PE add + masks ---
    x = params["emb"][tgt_ids].astype(f32) + params["pe"][:T][None].astype(f32)   # (B,T,D)
    causal = jnp.where(jnp.arange(T)[:, None] >= jnp.arange(T)[None, :],
                       0.0, NEG_INF).astype(f32)                                  # (T,T)
    kpad = jnp.where(mask, 0.0, NEG_INF).astype(f32).reshape(B, 1, T)             # (B,1,T)

    # --- fused / scale-folded weights (bf16 for MXU; biases & LN params stay f32) ---
    weights = {
        "sa_wqkv": jnp.concatenate(
            [params["sa_wq"] * scale, params["sa_wk"], params["sa_wv"]], axis=1).astype(bf16),
        "sa_bqkv": jnp.concatenate(
            [params["sa_bq"] * scale, params["sa_bk"], params["sa_bv"]], axis=1).astype(f32),
        "sa_wo": params["sa_wo"].astype(bf16), "sa_bo": params["sa_bo"].astype(f32),
        "ca_wq": (params["ca_wq"] * scale).astype(bf16),
        "ca_bq": (params["ca_bq"] * scale).astype(f32),
        "ca_wkv": jnp.concatenate([params["ca_wk"], params["ca_wv"]], axis=1).astype(bf16),
        "ca_bkv": jnp.concatenate([params["ca_bk"], params["ca_bv"]], axis=1).astype(f32),
        "ca_wo": params["ca_wo"].astype(bf16), "ca_bo": params["ca_bo"].astype(f32),
        "ln_g": params["ln_g"].astype(f32), "ln_b": params["ln_b"].astype(f32),
        "ff_w1": params["ff_w1"].astype(bf16), "ff_b1": params["ff_b1"].astype(f32),
        "ff_w2": params["ff_w2"].astype(bf16), "ff_b2": params["ff_b2"].astype(f32),
    }
    w_list = [weights[n] for n in BODY_WEIGHT_NAMES]

    BB = _batch_block(B)
    grid_b = B // BB

    def rep_spec(a):
        nd = a.ndim
        return pl.BlockSpec(a.shape, lambda b, _nd=nd: (0,) * _nd)

    # --- kernel 1: decoder layer + final norm -> hidden states (B, T, D) ---
    body_in_specs = [
        pl.BlockSpec((BB, T, D), lambda b: (b, 0, 0)),   # x (embedding + positional)
        pl.BlockSpec((BB, S, D), lambda b: (b, 0, 0)),   # encoder memory
        pl.BlockSpec((T, T), lambda b: (0, 0)),          # causal bias (replicated)
        pl.BlockSpec((BB, 1, T), lambda b: (b, 0, 0)),   # key-padding bias
    ] + [rep_spec(w) for w in w_list]

    hidden = pl.pallas_call(
        decoder_body_kernel,
        out_shape=jax.ShapeDtypeStruct((B, T, D), f32),
        grid_spec=pltpu.PrefetchScalarGridSpec(
            num_scalar_prefetch=0,
            grid=(grid_b,),
            in_specs=body_in_specs,
            out_specs=pl.BlockSpec((BB, T, D), lambda b: (b, 0, 0)),
        ),
        compiler_params=pltpu.CompilerParams(
            dimension_semantics=("parallel",),
            vmem_limit_bytes=VMEM_LIMIT),
    )(x, memory.astype(f32), causal, kpad, *w_list)

    # --- kernel 2: vocab projection, tiled over V with lane-dense (128-mult) output blocks ---
    tv = min(_round_up(tile_v, 128), _round_up(V, 128))
    v_pad = _round_up(V, tv)
    grid_v = v_pad // tv
    fc_w = params["fc_w"].astype(bf16)
    fc_b = params["fc_b"].astype(f32)
    if v_pad != V:
        fc_w = jnp.pad(fc_w, ((0, 0), (0, v_pad - V)))
        fc_b = jnp.pad(fc_b, ((0, 0), (0, v_pad - V)))

    logits = pl.pallas_call(
        fc_kernel,
        out_shape=jax.ShapeDtypeStruct((B, T, v_pad), out_dtype),
        grid_spec=pltpu.PrefetchScalarGridSpec(
            num_scalar_prefetch=0,
            grid=(grid_b, grid_v),
            in_specs=[
                pl.BlockSpec((BB, T, D), lambda b, v: (b, 0, 0)),
                pl.BlockSpec((D, tv), lambda b, v: (0, v)),
                pl.BlockSpec((1, tv), lambda b, v: (0, v)),
            ],
            out_specs=pl.BlockSpec((BB, T, tv), lambda b, v: (b, 0, v)),
        ),
        compiler_params=pltpu.CompilerParams(
            dimension_semantics=("parallel", "parallel"),
            vmem_limit_bytes=VMEM_LIMIT),
    )(hidden, fc_w, fc_b)

    return logits[..., :V]


def make_positional_embedding(max_len, emb_size):
    position = np.arange(max_len, dtype=np.float32)[:, None]
    div_term = np.exp(
        np.arange(0, emb_size, 2, dtype=np.float32) * (-math.log(10000.0) / emb_size))
    pe = np.zeros((max_len, emb_size), dtype=np.float32)
    pe[:, 0::2] = np.sin(position * div_term)
    pe[:, 1::2] = np.cos(position * div_term)
    return jnp.asarray(pe)


def init_params(key, vocab_size, d_model, dim_feedforward, max_len=64):
    D, F = d_model, dim_feedforward
    ks = jax.random.split(key, 24)

    def w(k, shape, scale=0.1):
        return jax.random.normal(k, shape, dtype=jnp.float32) * scale

    return {
        "emb": w(ks[0], (vocab_size, D), 1.0),
        "pe": make_positional_embedding(max_len, D),
        "sa_wq": w(ks[1], (D, D)), "sa_bq": w(ks[2], (1, D), 0.02),
        "sa_wk": w(ks[3], (D, D)), "sa_bk": w(ks[4], (1, D), 0.02),
        "sa_wv": w(ks[5], (D, D)), "sa_bv": w(ks[6], (1, D), 0.02),
        "sa_wo": w(ks[7], (D, D)), "sa_bo": w(ks[8], (1, D), 0.02),
        "ca_wq": w(ks[9], (D, D)), "ca_bq": w(ks[10], (1, D), 0.02),
        "ca_wk": w(ks[11], (D, D)), "ca_bk": w(ks[12], (1, D), 0.02),
        "ca_wv": w(ks[13], (D, D)), "ca_bv": w(ks[14], (1, D), 0.02),
        "ca_wo": w(ks[15], (D, D)), "ca_bo": w(ks[16], (1, D), 0.02),
        "ln_g": 1.0 + w(ks[17], (4, D), 0.02),   # norm1, norm2, norm3, final norm (gamma)
        "ln_b": w(ks[18], (4, D), 0.02),         # norm1, norm2, norm3, final norm (beta)
        "ff_w1": w(ks[19], (D, F)), "ff_b1": w(ks[20], (1, F), 0.02),
        "ff_w2": w(ks[21], (F, D)), "ff_b2": w(ks[22], (1, D), 0.02),
        "fc_w": w(ks[23], (D, vocab_size)), "fc_b": jnp.zeros((1, vocab_size), jnp.float32),
    }


def reference_forward(tgt_ids, memory, mask, p):
    """Pure-JAX reference of the same forward pass (for validation)."""
    B, T = tgt_ids.shape
    D = p["emb"].shape[1]
    x = p["emb"][tgt_ids] + p["pe"][:T][None]                  # (B, T, D)
    scale = 1.0 / math.sqrt(D)
    causal = jnp.where(jnp.arange(T)[:, None] >= jnp.arange(T)[None, :], 0.0, NEG_INF)
    kpad = jnp.where(mask, 0.0, NEG_INF)                       # (B, T)

    # self-attention
    q = x @ p["sa_wq"] + p["sa_bq"]
    k = x @ p["sa_wk"] + p["sa_bk"]
    v = x @ p["sa_wv"] + p["sa_bv"]
    s = jnp.einsum("btd,bsd->bts", q, k) * scale + causal[None] + kpad[:, None, :]
    a = jax.nn.softmax(s, axis=-1)
    sa = jnp.einsum("bts,bsd->btd", a, v) @ p["sa_wo"] + p["sa_bo"]
    x = _layer_norm(x + sa, p["ln_g"][0], p["ln_b"][0])

    # cross-attention
    q = x @ p["ca_wq"] + p["ca_bq"]
    k = memory @ p["ca_wk"] + p["ca_bk"]
    v = memory @ p["ca_wv"] + p["ca_bv"]
    s = jnp.einsum("btd,bsd->bts", q, k) * scale
    a = jax.nn.softmax(s, axis=-1)
    ca = jnp.einsum("bts,bsd->btd", a, v) @ p["ca_wo"] + p["ca_bo"]
    x = _layer_norm(x + ca, p["ln_g"][1], p["ln_b"][1])

    # feed-forward
    h = jax.nn.relu(x @ p["ff_w1"] + p["ff_b1"])
    ff = h @ p["ff_w2"] + p["ff_b2"]
    x = _layer_norm(x + ff, p["ln_g"][2], p["ln_b"][2])

    # final norm + fc
    x = _layer_norm(x, p["ln_g"][3], p["ln_b"][3])
    return x @ p["fc_w"] + p["fc_b"]


if __name__ == "__main__":
    vocab_size, d_model, dim_feedforward = 50, 32, 64
    B, T, S = 2, 8, 8

    key = jax.random.PRNGKey(0)
    kp, kt, km = jax.random.split(key, 3)
    params = init_params(kp, vocab_size, d_model, dim_feedforward)

    tgt_ids = jax.random.randint(kt, (B, T), 0, vocab_size, dtype=jnp.int32)
    memory = jax.random.normal(km, (B, S, d_model), dtype=jnp.float32)
    lengths = jnp.array([T, 5])
    mask = jnp.arange(T)[None, :] < lengths[:, None]   # (B, T) bool, True = valid token

    out = decoder_forward(tgt_ids, memory, mask, params)
    out = jax.block_until_ready(out)

    ref = reference_forward(tgt_ids, memory, mask, params)
    np.testing.assert_allclose(np.asarray(out), np.asarray(ref), rtol=5e-2, atol=5e-2)
    assert out.shape == (B, T, vocab_size)

    print("KERNEL_OK")
</pallas_src>

<mosaic_0001>
module attributes {stable_mosaic.version = 11 : i64} {
  func.func @decoder_body_kernel(%arg0: i32, %arg1: memref<2x8x32xf32, #tpu.memory_space<vmem>>, %arg2: memref<2x8x32xf32, #tpu.memory_space<vmem>>, %arg3: memref<8x8xf32, #tpu.memory_space<vmem>>, %arg4: memref<2x1x8xf32, #tpu.memory_space<vmem>>, %arg5: memref<32x96xbf16, #tpu.memory_space<vmem>>, %arg6: memref<1x96xf32, #tpu.memory_space<vmem>>, %arg7: memref<32x32xbf16, #tpu.memory_space<vmem>>, %arg8: memref<1x32xf32, #tpu.memory_space<vmem>>, %arg9: memref<32x32xbf16, #tpu.memory_space<vmem>>, %arg10: memref<1x32xf32, #tpu.memory_space<vmem>>, %arg11: memref<32x64xbf16, #tpu.memory_space<vmem>>, %arg12: memref<1x64xf32, #tpu.memory_space<vmem>>, %arg13: memref<32x32xbf16, #tpu.memory_space<vmem>>, %arg14: memref<1x32xf32, #tpu.memory_space<vmem>>, %arg15: memref<4x32xf32, #tpu.memory_space<vmem>>, %arg16: memref<4x32xf32, #tpu.memory_space<vmem>>, %arg17: memref<32x64xbf16, #tpu.memory_space<vmem>>, %arg18: memref<1x64xf32, #tpu.memory_space<vmem>>, %arg19: memref<64x32xbf16, #tpu.memory_space<vmem>>, %arg20: memref<1x32xf32, #tpu.memory_space<vmem>>, %arg21: memref<2x8x32xf32, #tpu.memory_space<vmem>>) attributes {dimension_semantics = [#tpu.dimension_semantics<parallel>], iteration_bounds = array<i64: 1>, scalar_prefetch = 0 : i64, scratch_operands = 0 : i64, tpu.core_type = #tpu.core_type<tc>, window_params = [{transform_indices = @transform_0, window_bounds = array<i64: 2, 8, 32>}, {transform_indices = @transform_1, window_bounds = array<i64: 2, 8, 32>}, {pipeline_mode = #tpu.pipeline_mode<synchronous>, transform_indices = @transform_2, window_bounds = array<i64: 8, 8>}, {transform_indices = @transform_3, window_bounds = array<i64: 2, 1, 8>}, {pipeline_mode = #tpu.pipeline_mode<synchronous>, transform_indices = @transform_4, window_bounds = array<i64: 32, 96>}, {pipeline_mode = #tpu.pipeline_mode<synchronous>, transform_indices = @transform_5, window_bounds = array<i64: 1, 96>}, {pipeline_mode = #tpu.pipeline_mode<synchronous>, transform_indices = @transform_6, window_bounds = array<i64: 32, 32>}, {pipeline_mode = #tpu.pipeline_mode<synchronous>, transform_indices = @transform_7, window_bounds = array<i64: 1, 32>}, {pipeline_mode = #tpu.pipeline_mode<synchronous>, transform_indices = @transform_8, window_bounds = array<i64: 32, 32>}, {pipeline_mode = #tpu.pipeline_mode<synchronous>, transform_indices = @transform_9, window_bounds = array<i64: 1, 32>}, {pipeline_mode = #tpu.pipeline_mode<synchronous>, transform_indices = @transform_10, window_bounds = array<i64: 32, 64>}, {pipeline_mode = #tpu.pipeline_mode<synchronous>, transform_indices = @transform_11, window_bounds = array<i64: 1, 64>}, {pipeline_mode = #tpu.pipeline_mode<synchronous>, transform_indices = @transform_12, window_bounds = array<i64: 32, 32>}, {pipeline_mode = #tpu.pipeline_mode<synchronous>, transform_indices = @transform_13, window_bounds = array<i64: 1, 32>}, {pipeline_mode = #tpu.pipeline_mode<synchronous>, transform_indices = @transform_14, window_bounds = array<i64: 4, 32>}, {pipeline_mode = #tpu.pipeline_mode<synchronous>, transform_indices = @transform_15, window_bounds = array<i64: 4, 32>}, {pipeline_mode = #tpu.pipeline_mode<synchronous>, transform_indices = @transform_16, window_bounds = array<i64: 32, 64>}, {pipeline_mode = #tpu.pipeline_mode<synchronous>, transform_indices = @transform_17, window_bounds = array<i64: 1, 64>}, {pipeline_mode = #tpu.pipeline_mode<synchronous>, transform_indices = @transform_18, window_bounds = array<i64: 64, 32>}, {pipeline_mode = #tpu.pipeline_mode<synchronous>, transform_indices = @transform_19, window_bounds = array<i64: 1, 32>}, {transform_indices = @transform_20, window_bounds = array<i64: 2, 8, 32>}]} {
    %c0 = arith.constant 0 : index
    %c0_0 = arith.constant 0 : index
    %c0_1 = arith.constant 0 : index
    %0 = vector.load %arg1[%c0, %c0_0, %c0_1] : memref<2x8x32xf32, #tpu.memory_space<vmem>>, vector<2x8x32xf32>
    %1 = vector.shape_cast %0 : vector<2x8x32xf32> to vector<16x32xf32>
    %c0_2 = arith.constant 0 : index
    %c0_3 = arith.constant 0 : index
    %2 = vector.load %arg3[%c0_2, %c0_3] : memref<8x8xf32, #tpu.memory_space<vmem>>, vector<8x8xf32>
    %c0_4 = arith.constant 0 : index
    %c0_5 = arith.constant 0 : index
    %c0_6 = arith.constant 0 : index
    %3 = vector.load %arg4[%c0_4, %c0_5, %c0_6] : memref<2x1x8xf32, #tpu.memory_space<vmem>>, vector<2x1x8xf32>
    %4 = vector.shape_cast %2 : vector<8x8xf32> to vector<1x8x8xf32>
    %5 = vector.broadcast %4 : vector<1x8x8xf32> to vector<2x8x8xf32>
    %6 = vector.broadcast %3 : vector<2x1x8xf32> to vector<2x8x8xf32>
    %7 = arith.addf %5, %6 : vector<2x8x8xf32>
    %c0_7 = arith.constant 0 : index
    %c0_8 = arith.constant 0 : index
    %8 = vector.load %arg5[%c0_7, %c0_8] : memref<32x96xbf16, #tpu.memory_space<vmem>>, vector<32x96xbf16>
    %9 = arith.truncf %1 : vector<16x32xf32> to vector<16x32xbf16>
    %cst = arith.constant dense<0.000000e+00> : vector<16x96xf32>
    %10 = tpu.matmul %9, %8, %cst {dimension_numbers = #tpu.dot_dimension_numbers<[1], [0], [0], [1], [0, 0, 1, 1], [], []>} : vector<16x32xbf16>, vector<32x96xbf16>, vector<16x96xf32> -> vector<16x96xf32>
    %c0_9 = arith.constant 0 : index
    %c0_10 = arith.constant 0 : index
    %11 = vector.load %arg6[%c0_9, %c0_10] : memref<1x96xf32, #tpu.memory_space<vmem>>, vector<1x96xf32>
    %12 = vector.broadcast %11 : vector<1x96xf32> to vector<16x96xf32>
    %13 = arith.addf %10, %12 : vector<16x96xf32>
    %14 = vector.extract_strided_slice %13 {offsets = [0, 0], sizes = [16, 32], strides = [1, 1]} : vector<16x96xf32> to vector<16x32xf32>
    %15 = vector.shape_cast %14 : vector<16x32xf32> to vector<2x8x32xf32>
    %16 = vector.extract_strided_slice %13 {offsets = [0, 32], sizes = [16, 32], strides = [1, 1]} : vector<16x96xf32> to vector<16x32xf32>
    %17 = vector.shape_cast %16 : vector<16x32xf32> to vector<2x8x32xf32>
    %18 = vector.extract_strided_slice %13 {offsets = [0, 64], sizes = [16, 32], strides = [1, 1]} : vector<16x96xf32> to vector<16x32xf32>
    %19 = vector.shape_cast %18 : vector<16x32xf32> to vector<2x8x32xf32>
    %20 = arith.truncf %15 : vector<2x8x32xf32> to vector<2x8x32xbf16>
    %21 = arith.truncf %17 : vector<2x8x32xf32> to vector<2x8x32xbf16>
    "tpu.trace_start"() <{level = 10 : i32, message = "btd,bsd->bts"}> : () -> ()
    %cst_11 = arith.constant dense<0.000000e+00> : vector<2x8x8xf32>
    %22 = tpu.matmul %20, %21, %cst_11 {dimension_numbers = #tpu.dot_dimension_numbers<[2], [2], [1], [1], [0, 0, 0, 1, 1, 1], [0], [0]>} : vector<2x8x32xbf16>, vector<2x8x32xbf16>, vector<2x8x8xf32> -> vector<2x8x8xf32>
    "tpu.trace_stop"() : () -> ()
    %23 = arith.addf %22, %7 : vector<2x8x8xf32>
    %cst_12 = arith.constant dense<0xFF800000> : vector<2x8xf32>
    %24 = vector.multi_reduction <maximumf>, %23, %cst_12 [2] : vector<2x8x8xf32> to vector<2x8xf32>
    %25 = vector.shape_cast %24 : vector<2x8xf32> to vector<2x8x1xf32>
    %26 = vector.broadcast %25 : vector<2x8x1xf32> to vector<2x8x8xf32>
    %27 = arith.subf %23, %26 : vector<2x8x8xf32>
    %28 = math.exp %27 : vector<2x8x8xf32>
    %cst_13 = arith.constant dense<0.000000e+00> : vector<2x8xf32>
    %29 = vector.multi_reduction <add>, %28, %cst_13 [2] : vector<2x8x8xf32> to vector<2x8xf32>
    %30 = vector.shape_cast %29 : vector<2x8xf32> to vector<2x8x1xf32>
    %31 = tpu.reciprocal %30 {approx = true} : vector<2x8x1xf32> -> vector<2x8x1xf32>
    %32 = vector.broadcast %31 : vector<2x8x1xf32> to vector<2x8x8xf32>
    %33 = arith.mulf %28, %32 : vector<2x8x8xf32>
    %34 = arith.truncf %33 : vector<2x8x8xf32> to vector<2x8x8xbf16>
    %35 = arith.truncf %19 : vector<2x8x32xf32> to vector<2x8x32xbf16>
    "tpu.trace_start"() <{level = 10 : i32, message = "bts,bsd->btd"}> : () -> ()
    %cst_14 = arith.constant dense<0.000000e+00> : vector<2x8x32xf32>
    %36 = tpu.matmul %34, %35, %cst_14 {dimension_numbers = #tpu.dot_dimension_numbers<[2], [1], [1], [2], [0, 0, 0, 1, 1, 2], [0], [0]>} : vector<2x8x8xbf16>, vector<2x8x32xbf16>, vector<2x8x32xf32> -> vector<2x8x32xf32>
    "tpu.trace_stop"() : () -> ()
    %37 = vector.shape_cast %36 : vector<2x8x32xf32> to vector<16x32xf32>
    %c0_15 = arith.constant 0 : index
    %c0_16 = arith.constant 0 : index
    %38 = vector.load %arg7[%c0_15, %c0_16] : memref<32x32xbf16, #tpu.memory_space<vmem>>, vector<32x32xbf16>
    %39 = arith.truncf %37 : vector<16x32xf32> to vector<16x32xbf16>
    %cst_17 = arith.constant dense<0.000000e+00> : vector<16x32xf32>
    %40 = tpu.matmul %39, %38, %cst_17 {dimension_numbers = #tpu.dot_dimension_numbers<[1], [0], [0], [1], [0, 0, 1, 1], [], []>} : vector<16x32xbf16>, vector<32x32xbf16>, vector<16x32xf32> -> vector<16x32xf32>
    %c0_18 = arith.constant 0 : index
    %c0_19 = arith.constant 0 : index
    %41 = vector.load %arg8[%c0_18, %c0_19] : memref<1x32xf32, #tpu.memory_space<vmem>>, vector<1x32xf32>
    %42 = vector.broadcast %41 : vector<1x32xf32> to vector<16x32xf32>
    %43 = arith.addf %40, %42 : vector<16x32xf32>
    %44 = arith.addf %1, %43 : vector<16x32xf32>
    %c0_20 = arith.constant 0 : index
    %c0_21 = arith.constant 0 : index
    %45 = vector.load %arg15[%c0_20, %c0_21] : memref<4x32xf32, #tpu.memory_space<vmem>>, vector<1x32xf32>
    %c0_22 = arith.constant 0 : index
    %c0_23 = arith.constant 0 : index
    %46 = vector.load %arg16[%c0_22, %c0_23] : memref<4x32xf32, #tpu.memory_space<vmem>>, vector<1x32xf32>
    %cst_24 = arith.constant dense<0.000000e+00> : vector<16xf32>
    %47 = vector.multi_reduction <add>, %44, %cst_24 [1] : vector<16x32xf32> to vector<16xf32>
    %48 = vector.shape_cast %47 : vector<16xf32> to vector<16x1xf32>
    %cst_25 = arith.constant 3.200000e+01 : f32
    %49 = vector.broadcast %cst_25 : f32 to vector<16x1xf32>
    %50 = arith.divf %48, %49 : vector<16x1xf32>
    %51 = vector.broadcast %50 : vector<16x1xf32> to vector<16x32xf32>
    %52 = arith.subf %44, %51 : vector<16x32xf32>
    %53 = arith.mulf %52, %52 : vector<16x32xf32>
    %cst_26 = arith.constant dense<0.000000e+00> : vector<16xf32>
    %54 = vector.multi_reduction <add>, %53, %cst_26 [1] : vector<16x32xf32> to vector<16xf32>
    %55 = vector.shape_cast %54 : vector<16xf32> to vector<16x1xf32>
    %cst_27 = arith.constant 3.200000e+01 : f32
    %56 = vector.broadcast %cst_27 : f32 to vector<16x1xf32>
    %57 = arith.divf %55, %56 : vector<16x1xf32>
    %58 = vector.broadcast %50 : vector<16x1xf32> to vector<16x32xf32>
    %59 = arith.subf %44, %58 : vector<16x32xf32>
    %cst_28 = arith.constant 9.99999974E-6 : f32
    %60 = vector.broadcast %cst_28 : f32 to vector<16x1xf32>
    %61 = arith.addf %57, %60 : vector<16x1xf32>
    %62 = math.rsqrt %61 : vector<16x1xf32>
    %63 = vector.broadcast %62 : vector<16x1xf32> to vector<16x32xf32>
    %64 = arith.mulf %59, %63 : vector<16x32xf32>
    %65 = vector.broadcast %45 : vector<1x32xf32> to vector<16x32xf32>
    %66 = arith.mulf %64, %65 : vector<16x32xf32>
    %67 = vector.broadcast %46 : vector<1x32xf32> to vector<16x32xf32>
    %68 = arith.addf %66, %67 : vector<16x32xf32>
    %c0_29 = arith.constant 0 : index
    %c0_30 = arith.constant 0 : index
    %69 = vector.load %arg9[%c0_29, %c0_30] : memref<32x32xbf16, #tpu.memory_space<vmem>>, vector<32x32xbf16>
    %70 = arith.truncf %68 : vector<16x32xf32> to vector<16x32xbf16>
    %cst_31 = arith.constant dense<0.000000e+00> : vector<16x32xf32>
    %71 = tpu.matmul %70, %69, %cst_31 {dimension_numbers = #tpu.dot_dimension_numbers<[1], [0], [0], [1], [0, 0, 1, 1], [], []>} : vector<16x32xbf16>, vector<32x32xbf16>, vector<16x32xf32> -> vector<16x32xf32>
    %c0_32 = arith.constant 0 : index
    %c0_33 = arith.constant 0 : index
    %72 = vector.load %arg10[%c0_32, %c0_33] : memref<1x32xf32, #tpu.memory_space<vmem>>, vector<1x32xf32>
    %73 = vector.broadcast %72 : vector<1x32xf32> to vector<16x32xf32>
    %74 = arith.addf %71, %73 : vector<16x32xf32>
    %75 = vector.shape_cast %74 : vector<16x32xf32> to vector<2x8x32xf32>
    %c0_34 = arith.constant 0 : index
    %c0_35 = arith.constant 0 : index
    %c0_36 = arith.constant 0 : index
    %76 = vector.load %arg2[%c0_34, %c0_35, %c0_36] : memref<2x8x32xf32, #tpu.memory_space<vmem>>, vector<2x8x32xf32>
    %77 = vector.shape_cast %76 : vector<2x8x32xf32> to vector<16x32xf32>
    %c0_37 = arith.constant 0 : index
    %c0_38 = arith.constant 0 : index
    %78 = vector.load %arg11[%c0_37, %c0_38] : memref<32x64xbf16, #tpu.memory_space<vmem>>, vector<32x64xbf16>
    %79 = arith.truncf %77 : vector<16x32xf32> to vector<16x32xbf16>
    %cst_39 = arith.constant dense<0.000000e+00> : vector<16x64xf32>
    %80 = tpu.matmul %79, %78, %cst_39 {dimension_numbers = #tpu.dot_dimension_numbers<[1], [0], [0], [1], [0, 0, 1, 1], [], []>} : vector<16x32xbf16>, vector<32x64xbf16>, vector<16x64xf32> -> vector<16x64xf32>
    %c0_40 = arith.constant 0 : index
    %c0_41 = arith.constant 0 : index
    %81 = vector.load %arg12[%c0_40, %c0_41] : memref<1x64xf32, #tpu.memory_space<vmem>>, vector<1x64xf32>
    %82 = vector.broadcast %81 : vector<1x64xf32> to vector<16x64xf32>
    %83 = arith.addf %80, %82 : vector<16x64xf32>
    %84 = vector.extract_strided_slice %83 {offsets = [0, 0], sizes = [16, 32], strides = [1, 1]} : vector<16x64xf32> to vector<16x32xf32>
    %85 = vector.shape_cast %84 : vector<16x32xf32> to vector<2x8x32xf32>
    %86 = vector.extract_strided_slice %83 {offsets = [0, 32], sizes = [16, 32], strides = [1, 1]} : vector<16x64xf32> to vector<16x32xf32>
    %87 = vector.shape_cast %86 : vector<16x32xf32> to vector<2x8x32xf32>
    %88 = arith.truncf %75 : vector<2x8x32xf32> to vector<2x8x32xbf16>
    %89 = arith.truncf %85 : vector<2x8x32xf32> to vector<2x8x32xbf16>
    "tpu.trace_start"() <{level = 10 : i32, message = "btd,bsd->bts"}> : () -> ()
    %cst_42 = arith.constant dense<0.000000e+00> : vector<2x8x8xf32>
    %90 = tpu.matmul %88, %89, %cst_42 {dimension_numbers = #tpu.dot_dimension_numbers<[2], [2], [1], [1], [0, 0, 0, 1, 1, 1], [0], [0]>} : vector<2x8x32xbf16>, vector<2x8x32xbf16>, vector<2x8x8xf32> -> vector<2x8x8xf32>
    "tpu.trace_stop"() : () -> ()
    %cst_43 = arith.constant dense<0xFF800000> : vector<2x8xf32>
    %91 = vector.multi_reduction <maximumf>, %90, %cst_43 [2] : vector<2x8x8xf32> to vector<2x8xf32>
    %92 = vector.shape_cast %91 : vector<2x8xf32> to vector<2x8x1xf32>
    %93 = vector.broadcast %92 : vector<2x8x1xf32> to vector<2x8x8xf32>
    %94 = arith.subf %90, %93 : vector<2x8x8xf32>
    %95 = math.exp %94 : vector<2x8x8xf32>
    %cst_44 = arith.constant dense<0.000000e+00> : vector<2x8xf32>
    %96 = vector.multi_reduction <add>, %95, %cst_44 [2] : vector<2x8x8xf32> to vector<2x8xf32>
    %97 = vector.shape_cast %96 : vector<2x8xf32> to vector<2x8x1xf32>
    %98 = tpu.reciprocal %97 {approx = true} : vector<2x8x1xf32> -> vector<2x8x1xf32>
    %99 = vector.broadcast %98 : vector<2x8x1xf32> to vector<2x8x8xf32>
    %100 = arith.mulf %95, %99 : vector<2x8x8xf32>
    %101 = arith.truncf %100 : vector<2x8x8xf32> to vector<2x8x8xbf16>
    %102 = arith.truncf %87 : vector<2x8x32xf32> to vector<2x8x32xbf16>
    "tpu.trace_start"() <{level = 10 : i32, message = "bts,bsd->btd"}> : () -> ()
    %cst_45 = arith.constant dense<0.000000e+00> : vector<2x8x32xf32>
    %103 = tpu.matmul %101, %102, %cst_45 {dimension_numbers = #tpu.dot_dimension_numbers<[2], [1], [1], [2], [0, 0, 0, 1, 1, 2], [0], [0]>} : vector<2x8x8xbf16>, vector<2x8x32xbf16>, vector<2x8x32xf32> -> vector<2x8x32xf32>
    "tpu.trace_stop"() : () -> ()
    %104 = vector.shape_cast %103 : vector<2x8x32xf32> to vector<16x32xf32>
    %c0_46 = arith.constant 0 : index
    %c0_47 = arith.constant 0 : index
    %105 = vector.load %arg13[%c0_46, %c0_47] : memref<32x32xbf16, #tpu.memory_space<vmem>>, vector<32x32xbf16>
    %106 = arith.truncf %104 : vector<16x32xf32> to vector<16x32xbf16>
    %cst_48 = arith.constant dense<0.000000e+00> : vector<16x32xf32>
    %107 = tpu.matmul %106, %105, %cst_48 {dimension_numbers = #tpu.dot_dimension_numbers<[1], [0], [0], [1], [0, 0, 1, 1], [], []>} : vector<16x32xbf16>, vector<32x32xbf16>, vector<16x32xf32> -> vector<16x32xf32>
    %c0_49 = arith.constant 0 : index
    %c0_50 = arith.constant 0 : index
    %108 = vector.load %arg14[%c0_49, %c0_50] : memref<1x32xf32, #tpu.memory_space<vmem>>, vector<1x32xf32>
    %109 = vector.broadcast %108 : vector<1x32xf32> to vector<16x32xf32>
    %110 = arith.addf %107, %109 : vector<16x32xf32>
    %111 = arith.addf %68, %110 : vector<16x32xf32>
    %c1 = arith.constant 1 : index
    %c0_51 = arith.constant 0 : index
    %112 = vector.load %arg15[%c1, %c0_51] : memref<4x32xf32, #tpu.memory_space<vmem>>, vector<1x32xf32>
    %c1_52 = arith.constant 1 : index
    %c0_53 = arith.constant 0 : index
    %113 = vector.load %arg16[%c1_52, %c0_53] : memref<4x32xf32, #tpu.memory_space<vmem>>, vector<1x32xf32>
    %cst_54 = arith.constant dense<0.000000e+00> : vector<16xf32>
    %114 = vector.multi_reduction <add>, %111, %cst_54 [1] : vector<16x32xf32> to vector<16xf32>
    %115 = vector.shape_cast %114 : vector<16xf32> to vector<16x1xf32>
    %cst_55 = arith.constant 3.200000e+01 : f32
    %116 = vector.broadcast %cst_55 : f32 to vector<16x1xf32>
    %117 = arith.divf %115, %116 : vector<16x1xf32>
    %118 = vector.broadcast %117 : vector<16x1xf32> to vector<16x32xf32>
    %119 = arith.subf %111, %118 : vector<16x32xf32>
    %120 = arith.mulf %119, %119 : vector<16x32xf32>
    %cst_56 = arith.constant dense<0.000000e+00> : vector<16xf32>
    %121 = vector.multi_reduction <add>, %120, %cst_56 [1] : vector<16x32xf32> to vector<16xf32>
    %122 = vector.shape_cast %121 : vector<16xf32> to vector<16x1xf32>
    %cst_57 = arith.constant 3.200000e+01 : f32
    %123 = vector.broadcast %cst_57 : f32 to vector<16x1xf32>
    %124 = arith.divf %122, %123 : vector<16x1xf32>
    %125 = vector.broadcast %117 : vector<16x1xf32> to vector<16x32xf32>
    %126 = arith.subf %111, %125 : vector<16x32xf32>
    %cst_58 = arith.constant 9.99999974E-6 : f32
    %127 = vector.broadcast %cst_58 : f32 to vector<16x1xf32>
    %128 = arith.addf %124, %127 : vector<16x1xf32>
    %129 = math.rsqrt %128 : vector<16x1xf32>
    %130 = vector.broadcast %129 : vector<16x1xf32> to vector<16x32xf32>
    %131 = arith.mulf %126, %130 : vector<16x32xf32>
    %132 = vector.broadcast %112 : vector<1x32xf32> to vector<16x32xf32>
    %133 = arith.mulf %131, %132 : vector<16x32xf32>
    %134 = vector.broadcast %113 : vector<1x32xf32> to vector<16x32xf32>
    %135 = arith.addf %133, %134 : vector<16x32xf32>
    %c0_59 = arith.constant 0 : index
    %c0_60 = arith.constant 0 : index
    %136 = vector.load %arg17[%c0_59, %c0_60] : memref<32x64xbf16, #tpu.memory_space<vmem>>, vector<32x64xbf16>
    %137 = arith.truncf %135 : vector<16x32xf32> to vector<16x32xbf16>
    %cst_61 = arith.constant dense<0.000000e+00> : vector<16x64xf32>
    %138 = tpu.matmul %137, %136, %cst_61 {dimension_numbers = #tpu.dot_dimension_numbers<[1], [0], [0], [1], [0, 0, 1, 1], [], []>} : vector<16x32xbf16>, vector<32x64xbf16>, vector<16x64xf32> -> vector<16x64xf32>
    %c0_62 = arith.constant 0 : index
    %c0_63 = arith.constant 0 : index
    %139 = vector.load %arg18[%c0_62, %c0_63] : memref<1x64xf32, #tpu.memory_space<vmem>>, vector<1x64xf32>
    %140 = vector.broadcast %139 : vector<1x64xf32> to vector<16x64xf32>
    %141 = arith.addf %138, %140 : vector<16x64xf32>
    %cst_64 = arith.constant 0.000000e+00 : f32
    %142 = vector.broadcast %cst_64 : f32 to vector<16x64xf32>
    %143 = arith.maximumf %141, %142 : vector<16x64xf32>
    %c0_65 = arith.constant 0 : index
    %c0_66 = arith.constant 0 : index
    %144 = vector.load %arg19[%c0_65, %c0_66] : memref<64x32xbf16, #tpu.memory_space<vmem>>, vector<64x32xbf16>
    %145 = arith.truncf %143 : vector<16x64xf32> to vector<16x64xbf16>
    %cst_67 = arith.constant dense<0.000000e+00> : vector<16x32xf32>
    %146 = tpu.matmul %145, %144, %cst_67 {dimension_numbers = #tpu.dot_dimension_numbers<[1], [0], [0], [1], [0, 0, 1, 1], [], []>} : vector<16x64xbf16>, vector<64x32xbf16>, vector<16x32xf32> -> vector<16x32xf32>
    %c0_68 = arith.constant 0 : index
    %c0_69 = arith.constant 0 : index
    %147 = vector.load %arg20[%c0_68, %c0_69] : memref<1x32xf32, #tpu.memory_space<vmem>>, vector<1x32xf32>
    %148 = vector.broadcast %147 : vector<1x32xf32> to vector<16x32xf32>
    %149 = arith.addf %146, %148 : vector<16x32xf32>
    %150 = arith.addf %135, %149 : vector<16x32xf32>
    %c2 = arith.constant 2 : index
    %c0_70 = arith.constant 0 : index
    %151 = vector.load %arg15[%c2, %c0_70] : memref<4x32xf32, #tpu.memory_space<vmem>>, vector<1x32xf32>
    %c2_71 = arith.constant 2 : index
    %c0_72 = arith.constant 0 : index
    %152 = vector.load %arg16[%c2_71, %c0_72] : memref<4x32xf32, #tpu.memory_space<vmem>>, vector<1x32xf32>
    %cst_73 = arith.constant dense<0.000000e+00> : vector<16xf32>
    %153 = vector.multi_reduction <add>, %150, %cst_73 [1] : vector<16x32xf32> to vector<16xf32>
    %154 = vector.shape_cast %153 : vector<16xf32> to vector<16x1xf32>
    %cst_74 = arith.constant 3.200000e+01 : f32
    %155 = vector.broadcast %cst_74 : f32 to vector<16x1xf32>
    %156 = arith.divf %154, %155 : vector<16x1xf32>
    %157 = vector.broadcast %156 : vector<16x1xf32> to vector<16x32xf32>
    %158 = arith.subf %150, %157 : vector<16x32xf32>
    %159 = arith.mulf %158, %158 : vector<16x32xf32>
    %cst_75 = arith.constant dense<0.000000e+00> : vector<16xf32>
    %160 = vector.multi_reduction <add>, %159, %cst_75 [1] : vector<16x32xf32> to vector<16xf32>
    %161 = vector.shape_cast %160 : vector<16xf32> to vector<16x1xf32>
    %cst_76 = arith.constant 3.200000e+01 : f32
    %162 = vector.broadcast %cst_76 : f32 to vector<16x1xf32>
    %163 = arith.divf %161, %162 : vector<16x1xf32>
    %164 = vector.broadcast %156 : vector<16x1xf32> to vector<16x32xf32>
    %165 = arith.subf %150, %164 : vector<16x32xf32>
    %cst_77 = arith.constant 9.99999974E-6 : f32
    %166 = vector.broadcast %cst_77 : f32 to vector<16x1xf32>
    %167 = arith.addf %163, %166 : vector<16x1xf32>
    %168 = math.rsqrt %167 : vector<16x1xf32>
    %169 = vector.broadcast %168 : vector<16x1xf32> to vector<16x32xf32>
    %170 = arith.mulf %165, %169 : vector<16x32xf32>
    %171 = vector.broadcast %151 : vector<1x32xf32> to vector<16x32xf32>
    %172 = arith.mulf %170, %171 : vector<16x32xf32>
    %173 = vector.broadcast %152 : vector<1x32xf32> to vector<16x32xf32>
    %174 = arith.addf %172, %173 : vector<16x32xf32>
    %c3 = arith.constant 3 : index
    %c0_78 = arith.constant 0 : index
    %175 = vector.load %arg15[%c3, %c0_78] : memref<4x32xf32, #tpu.memory_space<vmem>>, vector<1x32xf32>
    %c3_79 = arith.constant 3 : index
    %c0_80 = arith.constant 0 : index
    %176 = vector.load %arg16[%c3_79, %c0_80] : memref<4x32xf32, #tpu.memory_space<vmem>>, vector<1x32xf32>
    %cst_81 = arith.constant dense<0.000000e+00> : vector<16xf32>
    %177 = vector.multi_reduction <add>, %174, %cst_81 [1] : vector<16x32xf32> to vector<16xf32>
    %178 = vector.shape_cast %177 : vector<16xf32> to vector<16x1xf32>
    %cst_82 = arith.constant 3.200000e+01 : f32
    %179 = vector.broadcast %cst_82 : f32 to vector<16x1xf32>
    %180 = arith.divf %178, %179 : vector<16x1xf32>
    %181 = vector.broadcast %180 : vector<16x1xf32> to vector<16x32xf32>
    %182 = arith.subf %174, %181 : vector<16x32xf32>
    %183 = arith.mulf %182, %182 : vector<16x32xf32>
    %cst_83 = arith.constant dense<0.000000e+00> : vector<16xf32>
    %184 = vector.multi_reduction <add>, %183, %cst_83 [1] : vector<16x32xf32> to vector<16xf32>
    %185 = vector.shape_cast %184 : vector<16xf32> to vector<16x1xf32>
    %cst_84 = arith.constant 3.200000e+01 : f32
    %186 = vector.broadcast %cst_84 : f32 to vector<16x1xf32>
    %187 = arith.divf %185, %186 : vector<16x1xf32>
    %188 = vector.broadcast %180 : vector<16x1xf32> to vector<16x32xf32>
    %189 = arith.subf %174, %188 : vector<16x32xf32>
    %cst_85 = arith.constant 9.99999974E-6 : f32
    %190 = vector.broadcast %cst_85 : f32 to vector<16x1xf32>
    %191 = arith.addf %187, %190 : vector<16x1xf32>
    %192 = math.rsqrt %191 : vector<16x1xf32>
    %193 = vector.broadcast %192 : vector<16x1xf32> to vector<16x32xf32>
    %194 = arith.mulf %189, %193 : vector<16x32xf32>
    %195 = vector.broadcast %175 : vector<1x32xf32> to vector<16x32xf32>
    %196 = arith.mulf %194, %195 : vector<16x32xf32>
    %197 = vector.broadcast %176 : vector<1x32xf32> to vector<16x32xf32>
    %198 = arith.addf %196, %197 : vector<16x32xf32>
    %199 = vector.shape_cast %198 : vector<16x32xf32> to vector<2x8x32xf32>
    %c0_86 = arith.constant 0 : index
    %c0_87 = arith.constant 0 : index
    %c0_88 = arith.constant 0 : index
    %200 = vector.load %arg21[%c0_86, %c0_87, %c0_88] : memref<2x8x32xf32, #tpu.memory_space<vmem>>, vector<2x8x32xf32>
    tpu.vector_store %arg21[%c0_86, %c0_87, %c0_88], %199 {strides = array<i32>} : memref<2x8x32xf32, #tpu.memory_space<vmem>>, vector<2x8x32xf32>,
    return
  }
  func.func @transform_0(%arg0: i32) -> (i32, i32, i32) {
    %c0_i32 = arith.constant 0 : i32
    %c0_i32_0 = arith.constant 0 : i32
    %c0_i32_1 = arith.constant 0 : i32
    return %arg0, %c0_i32, %c0_i32_0 : i32, i32, i32
  }
  func.func @transform_1(%arg0: i32) -> (i32, i32, i32) {
    %c0_i32 = arith.constant 0 : i32
    %c0_i32_0 = arith.constant 0 : i32
    %c0_i32_1 = arith.constant 0 : i32
    return %arg0, %c0_i32, %c0_i32_0 : i32, i32, i32
  }
  func.func @transform_2(%arg0: i32) -> (i32, i32) {
    %c0_i32 = arith.constant 0 : i32
    %c0_i32_0 = arith.constant 0 : i32
    %c0_i32_1 = arith.constant 0 : i32
    return %c0_i32, %c0_i32_0 : i32, i32
  }
  func.func @transform_3(%arg0: i32) -> (i32, i32, i32) {
    %c0_i32 = arith.constant 0 : i32
    %c0_i32_0 = arith.constant 0 : i32
    %c0_i32_1 = arith.constant 0 : i32
    return %arg0, %c0_i32, %c0_i32_0 : i32, i32, i32
  }
  func.func @transform_4(%arg0: i32) -> (i32, i32) {
    %c0_i32 = arith.constant 0 : i32
    %c0_i32_0 = arith.constant 0 : i32
    %c0_i32_1 = arith.constant 0 : i32
    return %c0_i32, %c0_i32_0 : i32, i32
  }
  func.func @transform_5(%arg0: i32) -> (i32, i32) {
    %c0_i32 = arith.constant 0 : i32
    %c0_i32_0 = arith.constant 0 : i32
    %c0_i32_1 = arith.constant 0 : i32
    return %c0_i32, %c0_i32_0 : i32, i32
  }
  func.func @transform_6(%arg0: i32) -> (i32, i32) {
    %c0_i32 = arith.constant 0 : i32
    %c0_i32_0 = arith.constant 0 : i32
    %c0_i32_1 = arith.constant 0 : i32
    return %c0_i32, %c0_i32_0 : i32, i32
  }
  func.func @transform_7(%arg0: i32) -> (i32, i32) {
    %c0_i32 = arith.constant 0 : i32
    %c0_i32_0 = arith.constant 0 : i32
    %c0_i32_1 = arith.constant 0 : i32
    return %c0_i32, %c0_i32_0 : i32, i32
  }
  func.func @transform_8(%arg0: i32) -> (i32, i32) {
    %c0_i32 = arith.constant 0 : i32
    %c0_i32_0 = arith.constant 0 : i32
    %c0_i32_1 = arith.constant 0 : i32
    return %c0_i32, %c0_i32_0 : i32, i32
  }
  func.func @transform_9(%arg0: i32) -> (i32, i32) {
    %c0_i32 = arith.constant 0 : i32
    %c0_i32_0 = arith.constant 0 : i32
    %c0_i32_1 = arith.constant 0 : i32
    return %c0_i32, %c0_i32_0 : i32, i32
  }
  func.func @transform_10(%arg0: i32) -> (i32, i32) {
    %c0_i32 = arith.constant 0 : i32
    %c0_i32_0 = arith.constant 0 : i32
    %c0_i32_1 = arith.constant 0 : i32
    return %c0_i32, %c0_i32_0 : i32, i32
  }
  func.func @transform_11(%arg0: i32) -> (i32, i32) {
    %c0_i32 = arith.constant 0 : i32
    %c0_i32_0 = arith.constant 0 : i32
    %c0_i32_1 = arith.constant 0 : i32
    return %c0_i32, %c0_i32_0 : i32, i32
  }
  func.func @transform_12(%arg0: i32) -> (i32, i32) {
    %c0_i32 = arith.constant 0 : i32
    %c0_i32_0 = arith.constant 0 : i32
    %c0_i32_1 = arith.constant 0 : i32
    return %c0_i32, %c0_i32_0 : i32, i32
  }
  func.func @transform_13(%arg0: i32) -> (i32, i32) {
    %c0_i32 = arith.constant 0 : i32
    %c0_i32_0 = arith.constant 0 : i32
    %c0_i32_1 = arith.constant 0 : i32
    return %c0_i32, %c0_i32_0 : i32, i32
  }
  func.func @transform_14(%arg0: i32) -> (i32, i32) {
    %c0_i32 = arith.constant 0 : i32
    %c0_i32_0 = arith.constant 0 : i32
    %c0_i32_1 = arith.constant 0 : i32
    return %c0_i32, %c0_i32_0 : i32, i32
  }
  func.func @transform_15(%arg0: i32) -> (i32, i32) {
    %c0_i32 = arith.constant 0 : i32
    %c0_i32_0 = arith.constant 0 : i32
    %c0_i32_1 = arith.constant 0 : i32
    return %c0_i32, %c0_i32_0 : i32, i32
  }
  func.func @transform_16(%arg0: i32) -> (i32, i32) {
    %c0_i32 = arith.constant 0 : i32
    %c0_i32_0 = arith.constant 0 : i32
    %c0_i32_1 = arith.constant 0 : i32
    return %c0_i32, %c0_i32_0 : i32, i32
  }
  func.func @transform_17(%arg0: i32) -> (i32, i32) {
    %c0_i32 = arith.constant 0 : i32
    %c0_i32_0 = arith.constant 0 : i32
    %c0_i32_1 = arith.constant 0 : i32
    return %c0_i32, %c0_i32_0 : i32, i32
  }
  func.func @transform_18(%arg0: i32) -> (i32, i32) {
    %c0_i32 = arith.constant 0 : i32
    %c0_i32_0 = arith.constant 0 : i32
    %c0_i32_1 = arith.constant 0 : i32
    return %c0_i32, %c0_i32_0 : i32, i32
  }
  func.func @transform_19(%arg0: i32) -> (i32, i32) {
    %c0_i32 = arith.constant 0 : i32
    %c0_i32_0 = arith.constant 0 : i32
    %c0_i32_1 = arith.constant 0 : i32
    return %c0_i32, %c0_i32_0 : i32, i32
  }
  func.func @transform_20(%arg0: i32) -> (i32, i32, i32) {
    %c0_i32 = arith.constant 0 : i32
    %c0_i32_0 = arith.constant 0 : i32
    %c0_i32_1 = arith.constant 0 : i32
    return %arg0, %c0_i32, %c0_i32_0 : i32, i32, i32
  }
}

</mosaic_0001>

<bundles_post_ra>
// kernel: tpu_custom_call.1
= control target key start
LH: loop header
LB: loop body
LE: loop exit
PB: predicated region body
PF: predicated region fallthrough
CT: control target
= control target key end

     0   :  { %s2320_s0 = inlined_call_operand.vmem [shape: f32[2,8,32], index: 0, kind: input, shape index: {}]   ;;  %s2321_s1 = inlined_call_operand.vmem [shape: f32[2,8,32], index: 1, kind: input, shape index: {}]   ;;  %s2322_s2 = inlined_call_operand.hbm [shape: f32[8,8], index: 2, kind: input, shape index: {}]   ;;  %s2323_s3 = inlined_call_operand.hbm [shape: f32[2,1,8], index: 3, kind: input, shape index: {}]   ;;  %s2324_s4 = inlined_call_operand.vmem [shape: bf16[32,96], index: 4, kind: input, shape index: {}]   ;;  %s2325_s5 = inlined_call_operand.hbm [shape: f32[1,96], index: 5, kind: input, shape index: {}]   ;;  %s2326_s6 = inlined_call_operand.hbm [shape: bf16[32,32], index: 6, kind: input, shape index: {}]   ;;  %s2327_s7 = inlined_call_operand.hbm [shape: f32[1,32], index: 7, kind: input, shape index: {}]   ;;  %s2328_s8 = inlined_call_operand.hbm [shape: bf16[32,32], index: 8, kind: input, shape index: {}]   ;;  %s2329_s9 = inlined_call_operand.hbm [shape: f32[1,32], index: 9, kind: input, shape index: {}]   ;;  %s2330_s10 = inlined_call_operand.vmem [shape: bf16[32,64], index: 10, kind: input, shape index: {}]   ;;  %s2331_s11 = inlined_call_operand.hbm [shape: f32[1,64], index: 11, kind: input, shape index: {}]   ;;  %s2332_s12 = inlined_call_operand.hbm [shape: bf16[32,32], index: 12, kind: input, shape index: {}]   ;;  %s2333_s13 = inlined_call_operand.hbm [shape: f32[1,32], index: 13, kind: input, shape index: {}]   ;;  %s2334_s14 = inlined_call_operand.vmem [shape: f32[4,32], index: 14, kind: input, shape index: {}]   ;;  %s2335_s15 = inlined_call_operand.vmem [shape: f32[4,32], index: 15, kind: input, shape index: {}]   ;;  %s2336_s16 = inlined_call_operand.vmem [shape: bf16[32,64], index: 16, kind: input, shape index: {}]   ;;  %s2337_s17 = inlined_call_operand.vmem [shape: f32[1,64], index: 17, kind: input, shape index: {}]   ;;  %s2338_s18 = inlined_call_operand.vmem [shape: bf16[64,32], index: 18, kind: input, shape index: {}]   ;;  %s2339_s19 = inlined_call_operand.vmem [shape: f32[1,32], index: 19, kind: input, shape index: {}]   ;;  %s2340_s20 = inlined_call_operand.hbm [shape: f32[2,8,32], index: 20, kind: output, shape index: {}]  }
   0x1   :  { %2347 = sst [smem:[#allocation27_spill]] %s2320_s0 }
   0x2   :  { %2348 = sst [smem:[#allocation28_spill]] %s2321_s1 }
   0x3   :  { %2349 = sst [smem:[#allocation29_spill]] %s2322_s2 }
   0x4   :  { %2350 = sst [smem:[#allocation30_spill]] %s2323_s3 }
   0x5   :  { %2351 = sst [smem:[#allocation31_spill]] %s2324_s4 }
   0x6   :  { %2352 = sst [smem:[#allocation32_spill]] %s2340_s20 }
   0x7   :  { %25 = vsyncpa [#allocation3], 0 }
   0x8   :  { %26 = vsyncpa [#allocation6], 0 }
   0x9   :  { %27 = vsyncpa [#allocation9], 0 }
   0xa   :  { %28 = vsyncpa [#allocation12], 0 }
   0xb   :  { %29 = vsyncpa [#allocation15], 0 }
   0xc   :  { %30 = vsyncpa [#allocation18], 0 }
   0xd   :  { %31 = vsyncpa [#allocation4], 0  ;;  %s1858_s1 = smov [#allocation5]   ;;  %s2353_s2 = sld [smem:[#allocation30_spill]] }
   0xe   :  { %s51_s22 = sshll.u32 %s1858_s1, 4  ;;  %s52_s22 = int_to_ptr.vmem [resolvable:$true] %s51_s22 }
  0x13   :  { %s1602_s25 = scalar_lea.hbm %s2353_s2, 32 }
  0x14   :  { %p1603_p0 = scmp.ne.s32.totalorder %s2353_s2, %s1602_s25  ;;  %p1606_p1 = scmp.lt.u32.totalorder %s1602_s25, %s2353_s2 }
  0x16   :  { %p1608_p2 = pnand %p1606_p1, %p1603_p0 }
  0x18   :  { %1611 = shalt.err (!%p1608_p2)
}
  0x19   :  { %s1612_s4 = scalar_lea.vmem %s52_s22, 32  ;;  %p1617_p4 = scmp.lt.s32.totalorder %s52_s22, %s52_s22 }
  0x1a   :  { %p1613_p3 = scmp.ne.s32.totalorder %s52_s22, %s1612_s4  ;;  %p1618_p5 = scmp.lt.s32.totalorder %s1612_s4, %s1612_s4 }
  0x1c   :  { %p1619_p6 = por %p1618_p5, %p1617_p4 }
  0x1e   :  { %p1620_p7 = pnand %p1619_p6, %p1613_p3 }
  0x20   :  { %1623 = shalt.err (!%p1620_p7)
}
  0x21   :  { %s1859_s29 = smov 16   ;;  %s1860_s30 = smov 1  }
  0x22   :  { %57 = dma.hbm_to_vmem [thread:$0]  %s2353_s2, 32, %s52_s22, [#allocation6], %s1859_s29, %s1859_s29, %s1860_s30  }
  0x23   :  { %s1861_s1 = smov [#allocation8]   ;;  %s1624_s3 = scalar_lea.hbm %s2326_s6, 256 }
  0x24   :  { %s75_s23 = sshll.u32 %s1861_s1, 4  ;;  %p1625_p8 = scmp.ne.s32.totalorder %s2326_s6, %s1624_s3  ;;  %s76_s23 = int_to_ptr.vmem [resolvable:$true] %s75_s23 }
  0x25   :  { %p1628_p9 = scmp.lt.u32.totalorder %s1624_s3, %s2326_s6 }
  0x27   :  { %p1630_p10 = pnand %p1628_p9, %p1625_p8 }
  0x29   :  { %1633 = shalt.err (!%p1630_p10)
}
  0x2a   :  { %s1634_s20 = scalar_lea.vmem %s76_s23, 256  ;;  %p1639_p12 = scmp.lt.s32.totalorder %s76_s23, %s76_s23 }
  0x2b   :  { %p1635_p11 = scmp.ne.s32.totalorder %s76_s23, %s1634_s20  ;;  %p1640_p13 = scmp.lt.s32.totalorder %s1634_s20, %s1634_s20 }
  0x2d   :  { %p1641_p0 = por %p1640_p13, %p1639_p12 }
  0x2f   :  { %p1642_p1 = pnand %p1641_p0, %p1635_p11 }
  0x31   :  { %1645 = shalt.err (!%p1642_p1)
}
  0x32   :  { %s1862_s22 = smov 64   ;;  %s1863_s2 = smov 4  }
  0x33   :  { %81 = dma.hbm_to_vmem [thread:$0]  %s2326_s6, 256, %s76_s23, [#allocation9], %s1862_s22, %s1862_s22, %s1863_s2  }
  0x34   :  { %s1864_s0 = smov [#allocation11]   ;;  %s1865_s1 = smov [#allocation14]  }
  0x35   :  { %s97_s21 = sshll.u32 %s1864_s0, 4  ;;  %s122_s24 = sshll.u32 %s1865_s1, 4  ;;  %s98_s21 = int_to_ptr.vmem [resolvable:$true] %s97_s21  ;;  %s123_s24 = int_to_ptr.vmem [resolvable:$true] %s122_s24 }
  0x36   :  { %s1646_s3 = scalar_lea.hbm %s2328_s8, 256 }
  0x37   :  { %p1647_p2 = scmp.ne.s32.totalorder %s2328_s8, %s1646_s3  ;;  %p1650_p3 = scmp.lt.u32.totalorder %s1646_s3, %s2328_s8 }
  0x39   :  { %p1652_p4 = pnand %p1650_p3, %p1647_p2 }
  0x3b   :  { %1655 = shalt.err (!%p1652_p4)
}
  0x3c   :  { %s1656_s6 = scalar_lea.vmem %s98_s21, 256  ;;  %p1661_p6 = scmp.lt.s32.totalorder %s98_s21, %s98_s21 }
  0x3d   :  { %p1657_p5 = scmp.ne.s32.totalorder %s98_s21, %s1656_s6  ;;  %p1662_p7 = scmp.lt.s32.totalorder %s1656_s6, %s1656_s6 }
  0x3f   :  { %p1663_p8 = por %p1662_p7, %p1661_p6 }
  0x41   :  { %p1664_p9 = pnand %p1663_p8, %p1657_p5 }
  0x43   :  { %1667 = shalt.err (!%p1664_p9)
}
  0x44   :  { %103 = dma.hbm_to_vmem [thread:$0]  %s2328_s8, 256, %s98_s21, [#allocation12], %s1862_s22, %s1862_s22, %s1863_s2  }
  0x45   :  { %s1668_s1 = scalar_lea.hbm %s2331_s11, 16 }
  0x46   :  { %p1669_p10 = scmp.ne.s32.totalorder %s2331_s11, %s1668_s1  ;;  %p1672_p11 = scmp.lt.u32.totalorder %s1668_s1, %s2331_s11 }
  0x48   :  { %p1674_p12 = pnand %p1672_p11, %p1669_p10 }
  0x4a   :  { %1677 = shalt.err (!%p1674_p12)
}
  0x4b   :  { %s1678_s27 = scalar_lea.vmem %s123_s24, 16  ;;  %s1682_s28 = scalar_lea.vmem %s123_s24, 32 }
  0x4c   :  { %p1679_p13 = scmp.ne.s32.totalorder %s123_s24, %s1678_s27  ;;  %p1683_p0 = scmp.lt.s32.totalorder %s123_s24, %s123_s24 }
  0x4d   :  { %p1684_p1 = scmp.lt.s32.totalorder %s1682_s28, %s1678_s27 }
  0x4f   :  { %p1685_p2 = por %p1684_p1, %p1683_p0 }
  0x51   :  { %p1686_p3 = pnand %p1685_p2, %p1679_p13 }
  0x53   :  { %1689 = shalt.err (!%p1686_p3)
}
  0x54   :  { %125 = dma.hbm_to_vmem [thread:$0]  %s2331_s11, 16, %s123_s24, [#allocation15]  }
  0x55   :  { %s1866_s4 = smov [#allocation2]   ;;  %s1867_s23 = smov [#allocation7]  }
  0x56   :  { %s42_s6 = sshll.u32 %s1866_s4, 4  ;;  %s66_s29 = sshll.u32 %s1867_s23, 4  ;;  %s43_s6 = int_to_ptr.vmem [resolvable:$true] %s42_s6  ;;  %s67_s29 = int_to_ptr.vmem [resolvable:$true] %s66_s29 }
  0x57   :  { %s2354_s1 = sld [smem:[#allocation29_spill]] }
  0x5d   :  { %s1690_s25 = scalar_lea.hbm %s2354_s1, 128 }
  0x5e   :  { %p1691_p4 = scmp.ne.s32.totalorder %s2354_s1, %s1690_s25  ;;  %p1694_p5 = scmp.lt.u32.totalorder %s1690_s25, %s2354_s1 }
  0x60   :  { %p1696_p6 = pnand %p1694_p5, %p1691_p4 }
  0x62   :  { %1699 = shalt.err (!%p1696_p6)
}
  0x63   :  { %s1700_s11 = scalar_lea.vmem %s43_s6, 128  ;;  %p1705_p8 = scmp.lt.s32.totalorder %s43_s6, %s43_s6 }
  0x64   :  { %p1701_p7 = scmp.ne.s32.totalorder %s43_s6, %s1700_s11  ;;  %p1706_p9 = scmp.lt.s32.totalorder %s1700_s11, %s1700_s11 }
  0x66   :  { %p1707_p10 = por %p1706_p9, %p1705_p8 }
  0x68   :  { %p1708_p11 = pnand %p1707_p10, %p1701_p7 }
  0x6a   :  { %1711 = shalt.err (!%p1708_p11)
}
  0x6b   :  { %45 = dma.hbm_to_vmem [thread:$0]  %s2354_s1, 128, %s43_s6, [#allocation3]  }
  0x6c   :  { %s1712_s4 = scalar_lea.hbm %s2325_s5, 16 }
  0x6d   :  { %p1713_p12 = scmp.ne.s32.totalorder %s2325_s5, %s1712_s4  ;;  %p1716_p13 = scmp.lt.u32.totalorder %s1712_s4, %s2325_s5 }
  0x6f   :  { %p1718_p0 = pnand %p1716_p13, %p1713_p12 }
  0x71   :  { %1721 = shalt.err (!%p1718_p0)
}
  0x72   :  { %s1722_s20 = scalar_lea.vmem %s67_s29, 16  ;;  %s1726_s3 = scalar_lea.vmem %s67_s29, 32 }
  0x73   :  { %p1723_p1 = scmp.ne.s32.totalorder %s67_s29, %s1722_s20  ;;  %p1727_p2 = scmp.lt.s32.totalorder %s67_s29, %s67_s29 }
  0x74   :  { %p1728_p3 = scmp.lt.s32.totalorder %s1726_s3, %s1722_s20 }
  0x76   :  { %p1729_p4 = por %p1728_p3, %p1727_p2 }
  0x78   :  { %p1730_p5 = pnand %p1729_p4, %p1723_p1 }
  0x7a   :  { %1733 = shalt.err (!%p1730_p5)
}
  0x7b   :  { %69 = dma.hbm_to_vmem [thread:$0]  %s2325_s5, 16, %s67_s29, [#allocation6]  }
  0x7c   :  { %s1868_s26 = smov [#allocation10]   ;;  %s1869_s11 = smov [#allocation13]  }
  0x7d   :  { %s88_s27 = sshll.u32 %s1868_s26, 4  ;;  %s110_s24 = sshll.u32 %s1869_s11, 4  ;;  %s89_s27 = int_to_ptr.vmem [resolvable:$true] %s88_s27  ;;  %s111_s24 = int_to_ptr.vmem [resolvable:$true] %s110_s24 }
  0x7e   :  { %s1734_s21 = scalar_lea.hbm %s2327_s7, 16 }
  0x7f   :  { %p1735_p6 = scmp.ne.s32.totalorder %s2327_s7, %s1734_s21  ;;  %p1738_p7 = scmp.lt.u32.totalorder %s1734_s21, %s2327_s7 }
  0x81   :  { %p1740_p8 = pnand %p1738_p7, %p1735_p6 }
  0x83   :  { %1743 = shalt.err (!%p1740_p8)
}
  0x84   :  { %s1744_s5 = scalar_lea.vmem %s89_s27, 16  ;;  %s1748_s29 = scalar_lea.vmem %s89_s27, 32 }
  0x85   :  { %p1745_p9 = scmp.ne.s32.totalorder %s89_s27, %s1744_s5  ;;  %p1749_p10 = scmp.lt.s32.totalorder %s89_s27, %s89_s27 }
  0x86   :  { %p1750_p11 = scmp.lt.s32.totalorder %s1748_s29, %s1744_s5 }
  0x88   :  { %p1751_p12 = por %p1750_p11, %p1749_p10 }
  0x8a   :  { %p1752_p13 = pnand %p1751_p12, %p1745_p9 }
  0x8c   :  { %1755 = shalt.err (!%p1752_p13)
}
  0x8d   :  { %91 = dma.hbm_to_vmem [thread:$0]  %s2327_s7, 16, %s89_s27, [#allocation9]  }
  0x8e   :  { %s1756_s1 = scalar_lea.hbm %s2329_s9, 16 }
  0x8f   :  { %p1757_p0 = scmp.ne.s32.totalorder %s2329_s9, %s1756_s1  ;;  %p1760_p1 = scmp.lt.u32.totalorder %s1756_s1, %s2329_s9 }
  0x91   :  { %p1762_p2 = pnand %p1760_p1, %p1757_p0 }
  0x93   :  { %1765 = shalt.err (!%p1762_p2)
}
  0x94   :  { %s1766_s21 = scalar_lea.vmem %s111_s24, 16  ;;  %s1770_s4 = scalar_lea.vmem %s111_s24, 32 }
  0x95   :  { %p1767_p3 = scmp.ne.s32.totalorder %s111_s24, %s1766_s21  ;;  %p1771_p4 = scmp.lt.s32.totalorder %s111_s24, %s111_s24 }
  0x96   :  { %p1772_p5 = scmp.lt.s32.totalorder %s1770_s4, %s1766_s21 }
  0x98   :  { %p1773_p6 = por %p1772_p5, %p1771_p4 }
  0x9a   :  { %p1774_p7 = pnand %p1773_p6, %p1767_p3 }
  0x9c   :  { %1777 = shalt.err (!%p1774_p7)
}
  0x9d   :  { %113 = dma.hbm_to_vmem [thread:$0]  %s2329_s9, 16, %s111_s24, [#allocation12]  }
  0x9e   :  { %s1870_s23 = smov [#allocation16]   ;;  %s1871_s0 = smov [#allocation17]  }
  0x9f   :  { %s131_s30 = sshll.u32 %s1870_s23, 4  ;;  %s144_s5 = sshll.u32 %s1871_s0, 4  ;;  %s132_s30 = int_to_ptr.vmem [resolvable:$true] %s131_s30  ;;  %s145_s5 = int_to_ptr.vmem [resolvable:$true] %s144_s5 }
  0xa0   :  { %s1778_s20 = scalar_lea.hbm %s2332_s12, 256 }
  0xa1   :  { %p1779_p8 = scmp.ne.s32.totalorder %s2332_s12, %s1778_s20  ;;  %p1782_p9 = scmp.lt.u32.totalorder %s1778_s20, %s2332_s12 }
  0xa3   :  { %p1784_p10 = pnand %p1782_p9, %p1779_p8 }
  0xa5   :  { %1787 = shalt.err (!%p1784_p10)
}
  0xa6   :  { %s1788_s9 = scalar_lea.vmem %s132_s30, 256  ;;  %p1793_p12 = scmp.lt.s32.totalorder %s132_s30, %s132_s30 }
  0xa7   :  { %p1789_p11 = scmp.ne.s32.totalorder %s132_s30, %s1788_s9  ;;  %p1794_p13 = scmp.lt.s32.totalorder %s1788_s9, %s1788_s9 }
  0xa9   :  { %p1795_p0 = por %p1794_p13, %p1793_p12 }
  0xab   :  { %p1796_p1 = pnand %p1795_p0, %p1789_p11 }
  0xad   :  { %1799 = shalt.err (!%p1796_p1)
}
  0xae   :  { %137 = dma.hbm_to_vmem [thread:$0]  %s2332_s12, 256, %s132_s30, [#allocation15], %s1862_s22, %s1862_s22, %s1863_s2  }
  0xaf   :  { %s1800_s21 = scalar_lea.hbm %s2333_s13, 16 }
  0xb0   :  { %p1801_p2 = scmp.ne.s32.totalorder %s2333_s13, %s1800_s21  ;;  %p1804_p3 = scmp.lt.u32.totalorder %s1800_s21, %s2333_s13 }
  0xb2   :  { %p1806_p4 = pnand %p1804_p3, %p1801_p2 }
  0xb4   :  { %1809 = shalt.err (!%p1806_p4)
}
  0xb5   :  { %s1810_s0 = scalar_lea.vmem %s145_s5, 16  ;;  %s1814_s29 = scalar_lea.vmem %s145_s5, 32 }
  0xb6   :  { %p1811_p5 = scmp.ne.s32.totalorder %s145_s5, %s1810_s0  ;;  %p1815_p6 = scmp.lt.s32.totalorder %s145_s5, %s145_s5 }
  0xb7   :  { %p1816_p7 = scmp.lt.s32.totalorder %s1814_s29, %s1810_s0 }
  0xb9   :  { %p1817_p8 = por %p1816_p7, %p1815_p6 }
  0xbb   :  { %p1818_p9 = pnand %p1817_p8, %p1811_p5 }
  0xbd   :  { %1821 = shalt.err (!%p1818_p9)
}
  0xbe   :  { %147 = dma.hbm_to_vmem [thread:$0]  %s2333_s13, 16, %s145_s5, [#allocation18]  }
  0xbf   :  { %1844 = dma.done.wait [#allocation3], 128  }
  0xc0   :  { %1845 = vsyncadd [#allocation3], 4294967168 }
  0xc1   :  { %1846 = dma.done.wait [#allocation6], 48  }
  0xc2   :  { %1847 = vsyncadd [#allocation6], 4294967248 }
  0xc3   :  { %1848 = dma.done.wait [#allocation9], 272  }
  0xc4   :  { %1849 = vsyncadd [#allocation9], 4294967024 }
  0xc5   :  { %1850 = dma.done.wait [#allocation12], 272  }
  0xc6   :  { %1851 = vsyncadd [#allocation12], 4294967024 }
  0xc7   :  { %1852 = dma.done.wait [#allocation15], 272  }
  0xc8   :  { %1853 = vsyncadd [#allocation15], 4294967024 }
  0xc9   :  { %1854 = dma.done.wait [#allocation18], 16  }
  0xca   :  { %1855 = vsyncadd [#allocation18], 4294967280  ;;  %v1872_v0 = vmov 0.0   ;;  %vm1873_vm0 = vmmov 0   ;;  %s2355_s5 = sld [smem:[#allocation31_spill]]  ;;  %s2356_s1 = sld [smem:[#allocation27_spill]] }
  0xcb   :  { %1426 = vmatprep.subr.bf16.mxu1 %v1872_v0  ;;  %1430 = vmatprep.mubr.msk.bf16.mxu1 %vm1873_vm0, %v1872_v0  ;;  %vm234_vm1 = vcmask 261120   ;;  %v1341_v6 = vld [vmem:[#allocation7] ss:$0 sm:$0xff]  ;;  %s1874_s24 = smov 96   ;;  %v193_v19 = vld [vmem:[#allocation2] sm:$0xff]  ;;  %vm379_vm2 = vcmask 64512  }
  0xcc   :  { %1440 = vmatprep.subr.bf16.mxu0 %v1872_v0  ;;  %1442 = vmatprep.mubr.msk.bf16.mxu0 %vm1873_vm0, %v1872_v0  ;;  %v1339_v20 = vld [vmem:[#allocation5] ss:$0 sm:$0xff]  ;;  %v1340_v22 = vld [vmem:[#allocation5 + $0x1] ss:$0 sm:$0xff]  ;;  %vm409_vm3 = vcmask 1043456   ;;  %v1556_v58 = vld [vmem:[#allocation8] sm:$0xff]  }
  0xcd   :  { %v208_v21 = vadd.f32 %v1339_v20, %v193_v19  ;;  %v209_v26 = vadd.f32 %v1340_v22, %v193_v19  ;;  %v1557_v59 = vld [vmem:[#allocation8 + $0x8] sm:$0xff]   ;;  %s2357_s7 = sld [smem:[#allocation28_spill]]  ;;  %vm1188_vm4 = vcmask 523264   ;;  %s1875_s12 = smov [#allocation19]  }
  0xce   :  { %s1322_s2 = sshll.u32 %s1875_s12, 4  ;;  %s1323_s2 = int_to_ptr.vmem [resolvable:$true] %s1322_s2 }
  0xcf   :  { %s1822_s13 = scalar_lea.vmem %s1323_s2, 256  ;;  %p1827_p11 = scmp.lt.s32.totalorder %s1323_s2, %s1323_s2 }
  0xd0   :  { %v1554_v1 = vld [vmem:[%s2355_s5] sm:$0xff]   ;;  %v1555_v2 = vld [vmem:[%s2355_s5 + $0x8] sm:$0xff]   ;;  %p1823_p10 = scmp.ne.s32.totalorder %s1323_s2, %s1822_s13  ;;  %p1828_p12 = scmp.lt.s32.totalorder %s1822_s13, %s1822_s13 }
  0xd1   :  { %1427 = vmatpush3.bf16.msra.mxu1 %v1554_v1  ;;  %v2127_v3 = vld [vmem:[%s2356_s1] sm:$0xff]  ;;  %v2132_v4 = vld [vmem:[%s2356_s1 + $0x8] sm:$0xff] }
  0xd2   :  { %1428 = vmatprep.subr.bf16.mxu1 %v1872_v0  ;;  %v214_v5 = vpack.c.bf16 %v2132_v4, %v2127_v3  ;;  %p1829_p13 = por %p1828_p12, %p1827_p11 }
  0xd4   :  { %p1830_p0 = pnand %p1829_p13, %p1823_p10 }
  0xd5   :  { %1429 = vmatpush3.bf16.msra.mxu1 %v1555_v2 }
  0xd6   :  { %1434 = vmatprep.subr.bf16.mxu1 %v1872_v0 }
  0xd8   :  { %1431 = vmatmul.mubr.msk.bf16.vlgmr.msra.gmra.mrb[0].mxu1 %vm234_vm1, %v214_v5 }
  0xd9   :  { %1436 = vmatprep.mubr.msk.bf16.mxu1 %vm1873_vm0, %v1872_v0 }
 0x1ab   :  { %v272_v7 = vpop.f32.mrb[0].mxu1 }
 0x1ac   :  { %v273_v8 = vadd.f32 %v1341_v6, %v272_v7  ;;  %v1432_v9 = vpop.f32.mrb[1].mxu1 }
 0x1ad   :  { %v275_v10 = vpop.f32.mrb[2].mxu1 }
 0x1ae   :  { %v279_v11 = vpack.c.bf16 %v273_v8, %v273_v8  ;;  %v276_v12 = vadd.f32 %v1341_v6, %v275_v10  ;;  %v1433_v13 = vpop.f32.mrb[3].mxu1  ;;  %v1349_v8 = vld [vmem:[#allocation10] ss:$0 sm:$0xff] }
 0x1b0   :  { %282 = vrot.lane.b32.xlu0 %v279_v11, %s1874_s24  ;;  %v280_v14 = vpack.c.bf16 %v276_v12, %v276_v12 }
 0x1b4   :  { %331 = vrot.lane.b32.xlu0 %v280_v14, %s1874_s24 }
 0x222   :  { %v283_v15 = vpop.permute.xlu0 %282 }
 0x223   :  { %v288_v16 = vsel %vm234_vm1, %v283_v15, 0 }
 0x224   :  { %1435 = vmatpush3.bf16.xpose.msra.mxu1 %v288_v16 }
 0x225   :  { %1446 = vmatprep.subr.bf16.mxu1 %v1872_v0 }
 0x226   :  { %v332_v17 = vpop.permute.xlu0 %331 }
 0x227   :  { %v337_v18 = vsel %vm234_vm1, %v332_v17, 0 }
 0x228   :  { %1441 = vmatpush3.bf16.xpose.msra.mxu0 %v337_v18 }
 0x229   :  { %1452 = vmatprep.subr.bf16.mxu0 %v1872_v0 }
 0x22b   :  { %1437 = vmatmul.mubr.msk.bf16.vlgmr.msra.gmra.mrb[4].mxu1 %vm234_vm1, %v279_v11 }
 0x22c   :  { %1448 = vmatprep.mubr.msk.bf16.mxu1 %vm1873_vm0, %v1872_v0 }
 0x22f   :  { %1443 = vmatmul.mubr.msk.bf16.vlgmr.msra.gmra.mrb[0].mxu0 %vm234_vm1, %v280_v14 }
 0x230   :  { %1454 = vmatprep.mubr.msk.bf16.mxu0 %vm1873_vm0, %v1872_v0 }
 0x2fe   :  { %v324_v23 = vpop.f32.mrb[4].mxu1 }
 0x2ff   :  { %v325_v24 = vadd.f32 %v324_v23, %v208_v21  ;;  %v1438_v25 = vpop.f32.mrb[5].mxu1 }
 0x300   :  { %v327_v27 = vpop.f32.mrb[6].mxu1 }
 0x301   :  { %v1439_v28 = vpop.f32.mrb[7].mxu1  ;;  %v380_v29 = vsel %vm379_vm2, %v325_v24, -inf }
 0x302   :  { %v373_v30 = vpop.f32.mrb[0].mxu0  ;;  %381 = vmax.xlane.f32.xlu1 %v380_v29  ;;  %v1559_v28 = vld [vmem:[%s2330_s10 + $0x8] sm:$0xff]   ;;  %v680_v29 = vld [vmem:[%s2357_s7] sm:$0xff] }
 0x303   :  { %v374_v31 = vadd.f32 %v373_v30, %v209_v26  ;;  %v1444_v32 = vpop.f32.mrb[1].mxu0  ;;  %v681_v30 = vld [vmem:[%s2357_s7 + $0x8] sm:$0xff] }
 0x304   :  { %v376_v33 = vpop.f32.mrb[2].mxu0  ;;  %v1560_v32 = vld [vmem:[#allocation11] sm:$0xff]  }
 0x305   :  { %v1445_v34 = vpop.f32.mrb[3].mxu0  ;;  %v383_v35 = vsel %vm379_vm2, %v374_v31, -inf  ;;  %v1561_v33 = vld [vmem:[#allocation11 + $0x8] sm:$0xff]  }
 0x306   :  { %384 = vmax.xlane.f32.xlu1 %v383_v35 }
 0x317   :  { %404 = vrot.lane.b32.xlu1 %v279_v11, %s1862_s22 }
 0x38f   :  { %v382_v36 = vpop.xlane.xlu1 %381 }
 0x390   :  { %v386_v37 = vsub.f32 %v325_v24, %v382_v36 }
 0x392   :  { %v388_v38 = vmul.f32 1.442695, %v386_v37 }
 0x393   :  { %v385_v39 = vpop.xlane.xlu1 %384 }
 0x394   :  { %1570 = vpow2.f32 %v388_v38  ;;  %v387_v40 = vsub.f32 %v374_v31, %v385_v39  ;;  %v686_v31 = vpack.c.bf16 %v681_v30, %v680_v29 }
 0x396   :  { %v390_v41 = vmul.f32 1.442695, %v387_v40 }
 0x397   :  { %v405_v42 = vpop.permute.xlu1 %404 }
 0x398   :  { %1572 = vpow2.f32 %v390_v41  ;;  %v411_v43 = vsel %vm409_vm3, %v405_v42, 0  ;;  %v1353_v42 = vld [vmem:[%s2334_s14] ss:$0 sm:$0xff] }
 0x399   :  { %1447 = vmatpush3.bf16.msra.mxu1 %v411_v43 }
 0x39a   :  { %1458 = vmatprep.subr.bf16.mxu1 %v1872_v0 }
 0x39e   :  { %v1571_v44 = vpop.eup %1570 }
 0x39f   :  { %v392_v45 = vsel %vm379_vm2, %v1571_v44, 0.0 }
 0x3a0   :  { %393 = vadd.xlane.f32.xlu0 %v392_v45 }
 0x3a2   :  { %v1573_v46 = vpop.eup %1572 }
 0x3a3   :  { %v395_v47 = vsel %vm379_vm2, %v1573_v46, 0.0 }
 0x3a4   :  { %396 = vadd.xlane.f32.xlu1 %v395_v47 }
 0x3b5   :  { %453 = vrot.lane.b32.xlu1 %v280_v14, %s1862_s22 }
 0x42d   :  { %v394_v48 = vpop.xlane.xlu0 %393 }
 0x42e   :  { %1574 = vrcp.f32 %v394_v48 }
 0x431   :  { %v397_v49 = vpop.xlane.xlu1 %396 }
 0x432   :  { %1576 = vrcp.f32 %v397_v49 }
 0x435   :  { %v454_v50 = vpop.permute.xlu1 %453 }
 0x436   :  { %v459_v51 = vsel %vm409_vm3, %v454_v50, 0 }
 0x437   :  { %1453 = vmatpush3.bf16.msra.mxu0 %v459_v51  ;;  %v1359_v51 = vld [vmem:[#allocation14] ss:$0 sm:$0xff] }
 0x438   :  { %v1575_v52 = vpop.eup %1574  ;;  %1466 = vmatprep.subr.bf16.mxu0 %v1872_v0 }
 0x439   :  { %v400_v53 = vmul.f32 %v1575_v52, %v1571_v44 }
 0x43b   :  { %v402_v54 = vpack.c.bf16 %v400_v53, %v400_v53 }
 0x43c   :  { %v1577_v55 = vpop.eup %1576 }
 0x43d   :  { %v401_v56 = vmul.f32 %v1577_v55, %v1573_v46  ;;  %1449 = vmatmul.mubr.msk.bf16.vlgmr.msra.gmra.mrb[8].mxu1 %vm379_vm2, %v402_v54  ;;  %v1354_v46 = vld [vmem:[%s2335_s15] ss:$0 sm:$0xff] }
 0x43e   :  { %1462 = vmatprep.mubr.msk.bf16.mxu1 %vm1873_vm0, %v1872_v0  ;;  %1459 = vmatpush3.bf16.msra.mxu1 %v1556_v58 }
 0x43f   :  { %v403_v57 = vpack.c.bf16 %v401_v56, %v401_v56  ;;  %1460 = vmatprep.subr.bf16.mxu1 %v1872_v0 }
 0x441   :  { %1455 = vmatmul.mubr.msk.bf16.vlgmr.msra.gmra.mrb[4].mxu0 %vm379_vm2, %v403_v57 }
 0x442   :  { %1470 = vmatprep.mubr.msk.bf16.mxu0 %vm1873_vm0, %v1872_v0  ;;  %1461 = vmatpush3.bf16.msra.mxu1 %v1557_v59 }
 0x443   :  { %1474 = vmatprep.subr.bf16.mxu1 %v1872_v0  ;;  %1467 = vmatpush3.bf16.msra.mxu0 %v1560_v32 }
 0x444   :  { %1468 = vmatprep.subr.bf16.mxu0 %v1872_v0 }
 0x447   :  { %1469 = vmatpush3.bf16.msra.mxu0 %v1561_v33 }
 0x448   :  { %1482 = vmatprep.subr.bf16.mxu0 %v1872_v0 }
 0x510   :  { %v447_v60 = vpop.f32.mrb[8].mxu1 }
 0x511   :  { %v1450_v61 = vpop.f32.mrb[9].mxu1 }
 0x512   :  { %v450_v62 = vpop.f32.mrb[10].mxu1 }
 0x513   :  { %v1451_v63 = vpop.f32.mrb[11].mxu1  ;;  %v1355_v62 = vld [vmem:[#allocation13] ss:$0 sm:$0xff] }
 0x514   :  { %v495_v1 = vpop.f32.mrb[4].mxu0 }
 0x515   :  { %v505_v2 = vpack.c.bf16 %v495_v1, %v447_v60  ;;  %v1456_v5 = vpop.f32.mrb[5].mxu0 }
 0x516   :  { %v498_v6 = vpop.f32.mrb[6].mxu0 }
 0x517   :  { %v1457_v7 = vpop.f32.mrb[7].mxu0  ;;  %1463 = vmatmul.mubr.msk.bf16.vlgmr.msra.gmra.mrb[12].mxu1 %vm234_vm1, %v505_v2 }
 0x518   :  { %1478 = vmatprep.mubr.msk.bf16.mxu1 %vm1873_vm0, %v1872_v0 }
 0x5ea   :  { %v562_v9 = vpop.f32.mrb[12].mxu1 }
 0x5eb   :  { %v563_v10 = vadd.f32 %v1349_v8, %v562_v9  ;;  %v1464_v11 = vpop.f32.mrb[13].mxu1 }
 0x5ec   :  { %v565_v12 = vpop.f32.mrb[14].mxu1 }
 0x5ed   :  { %v566_v13 = vadd.f32 %v1349_v8, %v565_v12  ;;  %v1465_v14 = vpop.f32.mrb[15].mxu1  ;;  %v569_v15 = vadd.f32 %v563_v10, %v2127_v3 }
 0x5ef   :  { %v573_v16 = vsel %vm234_vm1, %v569_v15, 0.0  ;;  %v570_v17 = vadd.f32 %v566_v13, %v2132_v4  ;;  %v1558_v4 = vld [vmem:[%s2330_s10] sm:$0xff]  }
 0x5f0   :  { %574 = vadd.xlane.f32.xlu1 %v573_v16  ;;  %1475 = vmatpush3.bf16.msra.mxu1 %v1558_v4 }
 0x5f1   :  { %v576_v18 = vsel %vm234_vm1, %v570_v17, 0.0  ;;  %1476 = vmatprep.subr.bf16.mxu1 %v1872_v0 }
 0x5f2   :  { %577 = vadd.xlane.f32.xlu0 %v576_v18 }
 0x5f4   :  { %1477 = vmatpush3.bf16.msra.mxu1 %v1559_v28 }
 0x5f5   :  { %1488 = vmatprep.subr.bf16.mxu1 %v1872_v0 }
 0x5f7   :  { %1479 = vmatmul.mubr.msk.bf16.vlgmr.msra.gmra.mrb[16].mxu1 %vm234_vm1, %v686_v31 }
 0x5f8   :  { %1490 = vmatprep.mubr.msk.bf16.mxu1 %vm1873_vm0, %v1872_v0 }
 0x67d   :  { %v575_v19 = vpop.xlane.xlu1 %574 }
 0x67e   :  { %v580_v20 = vmul.f32 0.03125, %v575_v19 }
 0x67f   :  { %v578_v21 = vpop.xlane.xlu0 %577 }
 0x680   :  { %v582_v22 = vsub.f32 %v569_v15, %v580_v20  ;;  %v581_v23 = vmul.f32 0.03125, %v578_v21 }
 0x682   :  { %v583_v24 = vsub.f32 %v570_v17, %v581_v23  ;;  %v584_v25 = vmul.f32 %v582_v22, %v582_v22 }
 0x684   :  { %v586_v26 = vsel %vm234_vm1, %v584_v25, 0.0  ;;  %v585_v27 = vmul.f32 %v583_v24, %v583_v24 }
 0x685   :  { %587 = vadd.xlane.f32.xlu0 %v586_v26 }
 0x686   :  { %v589_v3 = vsel %vm234_vm1, %v585_v27, 0.0 }
 0x689   :  { %590 = vadd.xlane.f32.xlu0 %v589_v3 }
 0x6ca   :  { %v743_v52 = vpop.f32.mrb[16].mxu1 }
 0x6cb   :  { %v744_v53 = vadd.f32 %v1359_v51, %v743_v52  ;;  %v1480_v54 = vpop.f32.mrb[17].mxu1 }
 0x6cc   :  { %v746_v55 = vpop.f32.mrb[18].mxu1 }
 0x6cd   :  { %v752_v56 = vpack.c.bf16 %v744_v53, %v744_v53  ;;  %v747_v57 = vadd.f32 %v1359_v51, %v746_v55  ;;  %v1481_v58 = vpop.f32.mrb[19].mxu1  ;;  %v1367_v53 = vld [vmem:[#allocation17] ss:$0 sm:$0xff] }
 0x6cf   :  { %v758_v59 = vsel %vm234_vm1, %v752_v56, 0  ;;  %v753_v60 = vpack.c.bf16 %v747_v57, %v747_v57 }
 0x6d1   :  { %v804_v61 = vsel %vm234_vm1, %v753_v60, 0  ;;  %920 = vrot.lane.b32.xlu1 %v753_v60, %s1874_s24 }
 0x6d2   :  { %1489 = vmatpush3.bf16.xpose.msra.mxu1 %v804_v61 }
 0x6d3   :  { %1500 = vmatprep.subr.bf16.mxu1 %v1872_v0 }
 0x712   :  { %v588_v34 = vpop.xlane.xlu0 %587 }
 0x713   :  { %v592_v35 = vmul.f32 0.03125, %v588_v34 }
 0x715   :  { %v594_v36 = vadd.f32 1e-05, %v592_v35 }
 0x716   :  { %v591_v37 = vpop.xlane.xlu0 %590 }
 0x717   :  { %1578 = vrsqrt.f32 %v594_v36  ;;  %v593_v38 = vmul.f32 0.03125, %v591_v37 }
 0x719   :  { %v595_v39 = vadd.f32 1e-05, %v593_v38 }
 0x71b   :  { %1580 = vrsqrt.f32 %v595_v39 }
 0x721   :  { %v1579_v40 = vpop.eup %1578 }
 0x722   :  { %v598_v41 = vmul.f32 %v1579_v40, %v582_v22  ;;  %v1562_v40 = vld [vmem:[#allocation16] sm:$0xff]  }
 0x724   :  { %v604_v44 = vmul.f32 %v1353_v42, %v598_v41  ;;  %v1563_v41 = vld [vmem:[#allocation16 + $0x8] sm:$0xff]  }
 0x725   :  { %v1581_v43 = vpop.eup %1580 }
 0x726   :  { %v599_v45 = vmul.f32 %v1581_v43, %v583_v24  ;;  %v2205_v48 = vadd.f32 %v1354_v46, %v604_v44 }
 0x728   :  { %v605_v47 = vmul.f32 %v1353_v42, %v599_v45 }
 0x72a   :  { %v2207_v49 = vadd.f32 %v1354_v46, %v605_v47 }
 0x72c   :  { %v616_v50 = vpack.c.bf16 %v2207_v49, %v2205_v48 }
 0x72e   :  { %1471 = vmatmul.mubr.msk.bf16.vlgmr.msra.gmra.mrb[8].mxu0 %vm234_vm1, %v616_v50 }
 0x72f   :  { %1484 = vmatprep.mubr.msk.bf16.mxu0 %vm1873_vm0, %v1872_v0  ;;  %1483 = vmatpush3.bf16.xpose.msra.mxu0 %v758_v59 }
 0x730   :  { %1494 = vmatprep.subr.bf16.mxu0 %v1872_v0 }
 0x743   :  { %v921_v6 = vpop.permute.xlu1 %920 }
 0x744   :  { %v926_v11 = vsel %vm409_vm3, %v921_v6, 0 }
 0x801   :  { %v673_v63 = vpop.f32.mrb[8].mxu0 }
 0x802   :  { %v674_v1 = vadd.f32 %v1355_v62, %v673_v63  ;;  %v1472_v2 = vpop.f32.mrb[9].mxu0 }
 0x803   :  { %v676_v5 = vpop.f32.mrb[10].mxu0 }
 0x804   :  { %v750_v7 = vpack.c.bf16 %v674_v1, %v674_v1  ;;  %v677_v8 = vadd.f32 %v1355_v62, %v676_v5  ;;  %v1473_v9 = vpop.f32.mrb[11].mxu0 }
 0x806   :  { %v751_v10 = vpack.c.bf16 %v677_v8, %v677_v8  ;;  %1485 = vmatmul.mubr.msk.bf16.vlgmr.msra.gmra.mrb[12].mxu0 %vm234_vm1, %v750_v7 }
 0x807   :  { %1496 = vmatprep.mubr.msk.bf16.mxu0 %vm1873_vm0, %v1872_v0 }
 0x808   :  { %1491 = vmatmul.mubr.msk.bf16.vlgmr.msra.gmra.mrb[20].mxu1 %vm234_vm1, %v751_v10 }
 0x809   :  { %1501 = vmatpush3.bf16.msra.mxu1 %v926_v11  ;;  %1502 = vmatprep.mubr.msk.bf16.mxu1 %vm1873_vm0, %v1872_v0 }
 0x80a   :  { %1514 = vmatprep.subr.bf16.mxu1 %v1872_v0 }
 0x8d9   :  { %v794_v12 = vpop.f32.mrb[12].mxu0 }
 0x8da   :  { %v1486_v13 = vpop.f32.mrb[13].mxu0  ;;  %v846_v14 = vsel %vm379_vm2, %v794_v12, -inf }
 0x8db   :  { %847 = vmax.xlane.f32.xlu0 %v846_v14  ;;  %v797_v15 = vpop.f32.mrb[14].mxu0  ;;  %v840_v16 = vpop.f32.mrb[20].mxu1  ;;  %v1566_v13 = vld [vmem:[%s2338_s18] sm:$0xff]   ;;  %v1567_v14 = vld [vmem:[%s2338_s18 + $0x8] sm:$0xff]  }
 0x8dc   :  { %v1487_v17 = vpop.f32.mrb[15].mxu0  ;;  %v1492_v18 = vpop.f32.mrb[21].mxu1  ;;  %v849_v21 = vsel %vm379_vm2, %v840_v16, -inf }
 0x8dd   :  { %v843_v19 = vpop.f32.mrb[22].mxu1 }
 0x8de   :  { %v1493_v20 = vpop.f32.mrb[23].mxu1 }
 0x8df   :  { %850 = vmax.xlane.f32.xlu0 %v849_v21 }
 0x968   :  { %v848_v22 = vpop.xlane.xlu0 %847 }
 0x969   :  { %v852_v23 = vsub.f32 %v794_v12, %v848_v22  ;;  %v1565_v12 = vld [vmem:[%s2336_s16 + $0x8] sm:$0xff]   ;;  %v1371_v22 = vld [vmem:[%s2334_s14 + $0x1] ss:$0 sm:$0xff] }
 0x96b   :  { %v854_v24 = vmul.f32 1.442695, %v852_v23 }
 0x96c   :  { %v851_v25 = vpop.xlane.xlu0 %850 }
 0x96d   :  { %1582 = vpow2.f32 %v854_v24  ;;  %v853_v26 = vsub.f32 %v840_v16, %v851_v25 }
 0x96f   :  { %v856_v27 = vmul.f32 1.442695, %v853_v26 }
 0x971   :  { %1584 = vpow2.f32 %v856_v27  ;;  %v1372_v27 = vld [vmem:[%s2335_s15 + $0x1] ss:$0 sm:$0xff] }
 0x977   :  { %v1583_v3 = vpop.eup %1582 }
 0x978   :  { %v858_v4 = vsel %vm379_vm2, %v1583_v3, 0.0 }
 0x979   :  { %859 = vadd.xlane.f32.xlu0 %v858_v4 }
 0x97b   :  { %v1585_v28 = vpop.eup %1584 }
 0x97c   :  { %v861_v29 = vsel %vm379_vm2, %v1585_v28, 0.0 }
 0x97d   :  { %862 = vadd.xlane.f32.xlu0 %v861_v29 }
 0x993   :  { %871 = vrot.lane.b32.xlu0 %v752_v56, %s1874_s24 }
 0xa06   :  { %v860_v30 = vpop.xlane.xlu0 %859 }
 0xa07   :  { %1586 = vrcp.f32 %v860_v30  ;;  %v1568_v30 = vld [vmem:[%s2338_s18 + $0x10] sm:$0xff]  }
 0xa0a   :  { %v863_v31 = vpop.xlane.xlu0 %862 }
 0xa0b   :  { %1588 = vrcp.f32 %v863_v31  ;;  %v1569_v31 = vld [vmem:[%s2338_s18 + $0x18] sm:$0xff]  }
 0xa0e   :  { %v872_v32 = vpop.permute.xlu0 %871 }
 0xa0f   :  { %v877_v33 = vsel %vm409_vm3, %v872_v32, 0  ;;  %v1373_v32 = vld [vmem:[%s2337_s17] ss:$0 sm:$0xff] }
 0xa10   :  { %1495 = vmatpush3.bf16.msra.mxu0 %v877_v33 }
 0xa11   :  { %v1587_v34 = vpop.eup %1586  ;;  %1506 = vmatprep.subr.bf16.mxu0 %v1872_v0 }
 0xa12   :  { %v866_v35 = vmul.f32 %v1587_v34, %v1583_v3 }
 0xa14   :  { %v868_v36 = vpack.c.bf16 %v866_v35, %v866_v35 }
 0xa15   :  { %v1589_v37 = vpop.eup %1588 }
 0xa16   :  { %v867_v38 = vmul.f32 %v1589_v37, %v1585_v28  ;;  %1497 = vmatmul.mubr.msk.bf16.vlgmr.msra.gmra.mrb[16].mxu0 %vm379_vm2, %v868_v36 }
 0xa17   :  { %1510 = vmatprep.mubr.msk.bf16.mxu0 %vm1873_vm0, %v1872_v0  ;;  %1507 = vmatpush3.bf16.msra.mxu0 %v1562_v40 }
 0xa18   :  { %v869_v39 = vpack.c.bf16 %v867_v38, %v867_v38  ;;  %1508 = vmatprep.subr.bf16.mxu0 %v1872_v0 }
 0xa1a   :  { %1503 = vmatmul.mubr.msk.bf16.vlgmr.msra.gmra.mrb[24].mxu1 %vm379_vm2, %v869_v39 }
 0xa1b   :  { %1518 = vmatprep.mubr.msk.bf16.mxu1 %vm1873_vm0, %v1872_v0  ;;  %1509 = vmatpush3.bf16.msra.mxu0 %v1563_v41 }
 0xa1c   :  { %1522 = vmatprep.subr.bf16.mxu0 %v1872_v0 }
 0xae9   :  { %v913_v42 = vpop.f32.mrb[16].mxu0 }
 0xaea   :  { %v1498_v43 = vpop.f32.mrb[17].mxu0 }
 0xaeb   :  { %v916_v44 = vpop.f32.mrb[18].mxu0 }
 0xaec   :  { %v1499_v45 = vpop.f32.mrb[19].mxu0 }
 0xaed   :  { %v962_v46 = vpop.f32.mrb[24].mxu1 }
 0xaee   :  { %v972_v47 = vpack.c.bf16 %v962_v46, %v913_v42  ;;  %v1504_v50 = vpop.f32.mrb[25].mxu1 }
 0xaef   :  { %v965_v51 = vpop.f32.mrb[26].mxu1 }
 0xaf0   :  { %v1505_v52 = vpop.f32.mrb[27].mxu1  ;;  %1511 = vmatmul.mubr.msk.bf16.vlgmr.msra.gmra.mrb[20].mxu0 %vm234_vm1, %v972_v47 }
 0xaf1   :  { %1530 = vmatprep.mubr.msk.bf16.mxu0 %vm1873_vm0, %v1872_v0  ;;  %1523 = vmatpush3.bf16.msra.mxu0 %v1566_v13 }
 0xaf2   :  { %1524 = vmatprep.subr.bf16.mxu0 %v1872_v0 }
 0xaf5   :  { %1525 = vmatpush3.bf16.msra.mxu0 %v1567_v14 }
 0xaf6   :  { %1526 = vmatprep.subr.bf16.mxu0 %v1872_v0 }
 0xaf9   :  { %1527 = vmatpush3.bf16.msra.mxu0 %v1568_v30 }
 0xafa   :  { %1528 = vmatprep.subr.bf16.mxu0 %v1872_v0 }
 0xafd   :  { %1529 = vmatpush3.bf16.msra.mxu0 %v1569_v31 }
 0xbc3   :  { %v1029_v54 = vpop.f32.mrb[20].mxu0 }
 0xbc4   :  { %v1030_v55 = vadd.f32 %v1367_v53, %v1029_v54  ;;  %v1512_v56 = vpop.f32.mrb[21].mxu0 }
 0xbc5   :  { %v1032_v57 = vpop.f32.mrb[22].mxu0 }
 0xbc6   :  { %v1033_v58 = vadd.f32 %v1367_v53, %v1032_v57  ;;  %v1513_v59 = vpop.f32.mrb[23].mxu0  ;;  %v1036_v60 = vadd.f32 %v1030_v55, %v2205_v48 }
 0xbc8   :  { %v1040_v61 = vsel %vm234_vm1, %v1036_v60, 0.0  ;;  %v1037_v62 = vadd.f32 %v1033_v58, %v2207_v49  ;;  %v1564_v49 = vld [vmem:[%s2336_s16] sm:$0xff]  }
 0xbc9   :  { %1041 = vadd.xlane.f32.xlu1 %v1040_v61  ;;  %1515 = vmatpush3.bf16.msra.mxu1 %v1564_v49  ;;  %v1384_v49 = vld [vmem:[%s2335_s15 + $0x2] ss:$0 sm:$0xff] }
 0xbca   :  { %v1043_v63 = vsel %vm234_vm1, %v1037_v62, 0.0  ;;  %1516 = vmatprep.subr.bf16.mxu1 %v1872_v0  ;;  %v1377_v0 = vld [vmem:[%s2339_s19] ss:$0 sm:$0xff] }
 0xbcb   :  { %1044 = vadd.xlane.f32.xlu0 %v1043_v63 }
 0xbcd   :  { %1517 = vmatpush3.bf16.msra.mxu1 %v1565_v12 }
 0xc56   :  { %v1042_v1 = vpop.xlane.xlu1 %1041 }
 0xc57   :  { %v1046_v2 = vmul.f32 0.03125, %v1042_v1 }
 0xc58   :  { %v1045_v5 = vpop.xlane.xlu0 %1044 }
 0xc59   :  { %v1048_v6 = vsub.f32 %v1036_v60, %v1046_v2  ;;  %v1047_v7 = vmul.f32 0.03125, %v1045_v5 }
 0xc5b   :  { %v1049_v8 = vsub.f32 %v1037_v62, %v1047_v7  ;;  %v1050_v9 = vmul.f32 %v1048_v6, %v1048_v6 }
 0xc5d   :  { %v1052_v10 = vsel %vm234_vm1, %v1050_v9, 0.0  ;;  %v1051_v11 = vmul.f32 %v1049_v8, %v1049_v8 }
 0xc5e   :  { %1053 = vadd.xlane.f32.xlu0 %v1052_v10  ;;  %v1383_v10 = vld [vmem:[%s2334_s14 + $0x2] ss:$0 sm:$0xff] }
 0xc5f   :  { %v1055_v48 = vsel %vm234_vm1, %v1051_v11, 0.0 }
 0xc60   :  { %1056 = vadd.xlane.f32.xlu1 %v1055_v48 }
 0xceb   :  { %v1054_v15 = vpop.xlane.xlu0 %1053 }
 0xcec   :  { %v1058_v16 = vmul.f32 0.03125, %v1054_v15 }
 0xced   :  { %v1057_v17 = vpop.xlane.xlu1 %1056 }
 0xcee   :  { %v1060_v18 = vadd.f32 1e-05, %v1058_v16  ;;  %v1059_v19 = vmul.f32 0.03125, %v1057_v17 }
 0xcf0   :  { %1590 = vrsqrt.f32 %v1060_v18  ;;  %v1061_v20 = vadd.f32 1e-05, %v1059_v19 }
 0xcf2   :  { %1592 = vrsqrt.f32 %v1061_v20 }
 0xcfa   :  { %v1591_v21 = vpop.eup %1590 }
 0xcfb   :  { %v1064_v23 = vmul.f32 %v1591_v21, %v1048_v6 }
 0xcfc   :  { %v1593_v24 = vpop.eup %1592 }
 0xcfd   :  { %v1070_v25 = vmul.f32 %v1371_v22, %v1064_v23  ;;  %v1065_v26 = vmul.f32 %v1593_v24, %v1049_v8 }
 0xcff   :  { %v1071_v3 = vmul.f32 %v1371_v22, %v1065_v26  ;;  %v1076_v4 = vadd.f32 %v1372_v27, %v1070_v25 }
 0xd01   :  { %v1077_v28 = vadd.f32 %v1372_v27, %v1071_v3 }
 0xd03   :  { %v1082_v29 = vpack.c.bf16 %v1077_v28, %v1076_v4 }
 0xd05   :  { %1519 = vmatmul.mubr.msk.bf16.vlgmr.msra.gmra.mrb[28].mxu1 %vm234_vm1, %v1082_v29 }
 0xdd8   :  { %v1139_v33 = vpop.f32.mrb[28].mxu1 }
 0xdd9   :  { %v1140_v34 = vadd.f32 %v1373_v32, %v1139_v33  ;;  %v1520_v35 = vpop.f32.mrb[29].mxu1 }
 0xdda   :  { %v1142_v36 = vpop.f32.mrb[30].mxu1 }
 0xddb   :  { %v1143_v37 = vadd.f32 %v1373_v32, %v1142_v36  ;;  %v1521_v38 = vpop.f32.mrb[31].mxu1  ;;  %v1146_v39 = vmax.f32 %v1140_v34, 0.0  ;;  %v1385_v34 = vld [vmem:[%s2334_s14 + $0x3] ss:$0 sm:$0xff] }
 0xddd   :  { %v1147_v40 = vmax.f32 %v1143_v37, 0.0  ;;  %v1386_v37 = vld [vmem:[%s2335_s15 + $0x3] ss:$0 sm:$0xff] }
 0xddf   :  { %v1156_v41 = vpack.c.bf16 %v1147_v40, %v1146_v39 }
 0xde1   :  { %1531 = vmatmul.mubr.msk.bf16.vlgmr.msra.gmra.mrb[24].mxu0 %vm1188_vm4, %v1156_v41 }
 0xeb4   :  { %v1226_v42 = vpop.f32.mrb[24].mxu0 }
 0xeb5   :  { %v1227_v43 = vadd.f32 %v1377_v0, %v1226_v42  ;;  %v1532_v44 = vpop.f32.mrb[25].mxu0 }
 0xeb6   :  { %v1229_v45 = vpop.f32.mrb[26].mxu0 }
 0xeb7   :  { %v1230_v46 = vadd.f32 %v1377_v0, %v1229_v45  ;;  %v1533_v47 = vpop.f32.mrb[27].mxu0  ;;  %v1233_v50 = vadd.f32 %v1227_v43, %v1076_v4 }
 0xeb9   :  { %v1237_v51 = vsel %vm234_vm1, %v1233_v50, 0.0  ;;  %v1234_v52 = vadd.f32 %v1230_v46, %v1077_v28 }
 0xeba   :  { %1238 = vadd.xlane.f32.xlu0 %v1237_v51 }
 0xebb   :  { %v1240_v53 = vsel %vm234_vm1, %v1234_v52, 0.0 }
 0xebc   :  { %1241 = vadd.xlane.f32.xlu1 %v1240_v53 }
 0xf47   :  { %v1239_v54 = vpop.xlane.xlu0 %1238 }
 0xf48   :  { %v1243_v55 = vmul.f32 0.03125, %v1239_v54 }
 0xf49   :  { %v1242_v56 = vpop.xlane.xlu1 %1241 }
 0xf4a   :  { %v1245_v57 = vsub.f32 %v1233_v50, %v1243_v55  ;;  %v1244_v58 = vmul.f32 0.03125, %v1242_v56 }
 0xf4c   :  { %v1246_v59 = vsub.f32 %v1234_v52, %v1244_v58  ;;  %v1247_v60 = vmul.f32 %v1245_v57, %v1245_v57 }
 0xf4e   :  { %v1249_v61 = vsel %vm234_vm1, %v1247_v60, 0.0  ;;  %v1248_v62 = vmul.f32 %v1246_v59, %v1246_v59 }
 0xf4f   :  { %1250 = vadd.xlane.f32.xlu0 %v1249_v61 }
 0xf50   :  { %v1252_v63 = vsel %vm234_vm1, %v1248_v62, 0.0 }
 0xf51   :  { %1253 = vadd.xlane.f32.xlu1 %v1252_v63 }
 0xfdc   :  { %v1251_v1 = vpop.xlane.xlu0 %1250 }
 0xfdd   :  { %v1255_v2 = vmul.f32 0.03125, %v1251_v1 }
 0xfde   :  { %v1254_v5 = vpop.xlane.xlu1 %1253 }
 0xfdf   :  { %v1257_v6 = vadd.f32 1e-05, %v1255_v2  ;;  %v1256_v7 = vmul.f32 0.03125, %v1254_v5 }
 0xfe1   :  { %1594 = vrsqrt.f32 %v1257_v6  ;;  %v1258_v8 = vadd.f32 1e-05, %v1256_v7 }
 0xfe3   :  { %1596 = vrsqrt.f32 %v1258_v8 }
 0xfeb   :  { %v1595_v9 = vpop.eup %1594 }
 0xfec   :  { %v1261_v11 = vmul.f32 %v1595_v9, %v1245_v57 }
 0xfed   :  { %v1597_v48 = vpop.eup %1596 }
 0xfee   :  { %v1267_v12 = vmul.f32 %v1383_v10, %v1261_v11  ;;  %v1262_v13 = vmul.f32 %v1597_v48, %v1246_v59 }
 0xff0   :  { %v1273_v14 = vadd.f32 %v1384_v49, %v1267_v12  ;;  %v1268_v15 = vmul.f32 %v1383_v10, %v1262_v13 }
 0xff2   :  { %v1277_v16 = vsel %vm234_vm1, %v1273_v14, 0.0  ;;  %v1274_v17 = vadd.f32 %v1384_v49, %v1268_v15 }
 0xff3   :  { %1278 = vadd.xlane.f32.xlu0 %v1277_v16 }
 0xff4   :  { %v1280_v18 = vsel %vm234_vm1, %v1274_v17, 0.0 }
 0xff5   :  { %1281 = vadd.xlane.f32.xlu1 %v1280_v18 }
0x1080   :  { %v1279_v19 = vpop.xlane.xlu0 %1278 }
0x1081   :  { %v1283_v20 = vmul.f32 0.03125, %v1279_v19 }
0x1082   :  { %v1282_v21 = vpop.xlane.xlu1 %1281 }
0x1083   :  { %v1285_v22 = vsub.f32 %v1273_v14, %v1283_v20  ;;  %v1284_v23 = vmul.f32 0.03125, %v1282_v21 }
0x1085   :  { %v1286_v24 = vsub.f32 %v1274_v17, %v1284_v23  ;;  %v1287_v25 = vmul.f32 %v1285_v22, %v1285_v22 }
0x1087   :  { %v1289_v26 = vsel %vm234_vm1, %v1287_v25, 0.0  ;;  %v1288_v27 = vmul.f32 %v1286_v24, %v1286_v24 }
0x1088   :  { %1290 = vadd.xlane.f32.xlu0 %v1289_v26 }
0x1089   :  { %v1292_v3 = vsel %vm234_vm1, %v1288_v27, 0.0 }
0x108a   :  { %1293 = vadd.xlane.f32.xlu1 %v1292_v3 }
0x1115   :  { %v1291_v4 = vpop.xlane.xlu0 %1290 }
0x1116   :  { %v1295_v28 = vmul.f32 0.03125, %v1291_v4 }
0x1117   :  { %v1294_v29 = vpop.xlane.xlu1 %1293 }
0x1118   :  { %v1297_v30 = vadd.f32 1e-05, %v1295_v28  ;;  %v1296_v31 = vmul.f32 0.03125, %v1294_v29 }
0x111a   :  { %1598 = vrsqrt.f32 %v1297_v30  ;;  %v1298_v32 = vadd.f32 1e-05, %v1296_v31 }
0x111c   :  { %1600 = vrsqrt.f32 %v1298_v32 }
0x1124   :  { %v1599_v33 = vpop.eup %1598 }
0x1125   :  { %v1301_v35 = vmul.f32 %v1599_v33, %v1285_v22 }
0x1126   :  { %v1601_v36 = vpop.eup %1600 }
0x1127   :  { %v1307_v38 = vmul.f32 %v1385_v34, %v1301_v35  ;;  %v1302_v39 = vmul.f32 %v1601_v36, %v1286_v24 }
0x1129   :  { %v1308_v40 = vmul.f32 %v1385_v34, %v1302_v39  ;;  %v1313_v41 = vadd.f32 %v1386_v37, %v1307_v38 }
0x112b   :  { %v1314_v0 = vadd.f32 %v1386_v37, %v1308_v40  ;;  %1315 = vst.msk [vmem:[#allocation19] sm:$0xff] %vm234_vm1, %v1313_v41 }
0x112d   :  { %1316 = vst.msk [vmem:[#allocation19 + $0x8] sm:$0xff] %vm234_vm1, %v1314_v0 }
0x112e   :  { %1833 = shalt.err (!%p1830_p0)
}
0x112f   :  { %s2358_s30 = sld [smem:[#allocation32_spill]] }
0x1135   :  { %s1834_s5 = scalar_lea.hbm %s2358_s30, 256 }
0x1136   :  { %p1835_p1 = scmp.ne.s32.totalorder %s2358_s30, %s1834_s5  ;;  %p1838_p2 = scmp.lt.u32.totalorder %s1834_s5, %s2358_s30 }
0x1138   :  { %p1840_p3 = pnand %p1838_p2, %p1835_p1 }
0x113a   :  { %1843 = shalt.err (!%p1840_p3)
}
0x113b   :  { %s1876_s16 = smov 128   ;;  %s1877_s1 = smov 8  }
0x113c   :  { %1328 = dma.vmem_to_hbm [thread:$0]  %s1323_s2, 256, %s2358_s30, [#allocation4], %s1876_s16, %s1876_s16, %s1877_s1  }
0x113d   :  { %1856 = dma.done.wait [#allocation4], 256  }
0x113e   :  { %1857 = vsyncadd [#allocation4], 4294967040 }
0x113f   :  { %1332 = vsyncpa [#allocation3], 1 }
0x1140   :  { %1333 = vsyncpa [#allocation6], 1 }
0x1141   :  { %1334 = vsyncpa [#allocation9], 1 }
0x1142   :  { %1335 = vsyncpa [#allocation12], 1 }
0x1143   :  { %1336 = vsyncpa [#allocation15], 1 }
0x1144   :  { %1337 = vsyncpa [#allocation18], 1 }
0x1145   :  { %1338 = vsyncpa [#allocation4], 1 }

</bundles_post_ra>
